<compile_context>
chip_gen: v5e
topology: v5e:2x2
jax: 0.10.0
libtpu: 0.0.40
codegen_flags: <defaults>
</compile_context>

<pallas_src>
import functools

import jax
import jax.numpy as jnp
from jax.experimental import pallas as pl
from jax.experimental.pallas import tpu as pltpu

LN_EPS = 1e-5        # torch.nn.LayerNorm default
TB_ALIGN = 16        # bf16-friendly sublane multiple for the batch tile


def _round_up(x, m):
    return ((x + m - 1) // m) * m


def _ln_relu_bf16(h, gamma, beta, true_n):
    """Fused LayerNorm (over a zero-padded lane axis) + affine + ReLU + bf16 cast.

    Pad lanes of `h` are exactly 0, so sums over all lanes equal sums over the
    true lanes; dividing by the true feature count and using var = E[x^2]-mu^2
    gives statistics identical to an unpadded LayerNorm.  gamma/beta are 0 in
    pad lanes, so the padded output lanes stay exactly 0.
    """
    inv_n = 1.0 / true_n
    s1 = jnp.sum(h, axis=-1, keepdims=True)
    s2 = jnp.sum(h * h, axis=-1, keepdims=True)
    mu = s1 * inv_n
    var = jnp.maximum(s2 * inv_n - mu * mu, 0.0)
    inv_sigma = jax.lax.rsqrt(var + LN_EPS)
    # Single sweep: normalise, scale/shift, ReLU, cast to bf16 for the next MXU op.
    return jnp.maximum((h - mu) * inv_sigma * gamma + beta, 0.0).astype(jnp.bfloat16)


def actor_kernel(x_ref,
                 w1_ref, aux1_ref,
                 w2_ref, aux2_ref,
                 w3_ref, b3_ref,
                 out_ref, *, f1_true, f2_true):
    # aux*_ref rows: 0 = bias, 1 = gamma, 2 = beta (all f32, lane-padded).
    # fc1 -> LayerNorm -> ReLU   (bf16 operands into the MXU, f32 accumulate)
    x = x_ref[...].astype(jnp.bfloat16)
    h = jnp.dot(x, w1_ref[...], preferred_element_type=jnp.float32) + aux1_ref[0:1, :]
    h = _ln_relu_bf16(h, aux1_ref[1:2, :], aux1_ref[2:3, :], f1_true)

    # fc2 -> LayerNorm -> ReLU
    h = jnp.dot(h, w2_ref[...], preferred_element_type=jnp.float32) + aux2_ref[0:1, :]
    h = _ln_relu_bf16(h, aux2_ref[1:2, :], aux2_ref[2:3, :], f2_true)

    # mu head -> Tanh  (lane-dense 128-wide padded output, stored as bf16)
    h = jnp.dot(h, w3_ref[...], preferred_element_type=jnp.float32) + b3_ref[...]
    out_ref[...] = jnp.tanh(h).astype(out_ref.dtype)


def init_params(key, num_observations, num_actions, fc1_size=400, fc2_size=300):
    """True-shape f32 parameters mirroring the PyTorch __init__.

    The reference uses f = 1/sqrt(weight.size(0)) which for nn.Linear(in, out)
    is 1/sqrt(out_features); reproduced exactly.  Weights are stored as
    (in, out) = transpose of PyTorch's (out, in) so y = x @ W + b.
    """
    k = jax.random.split(key, 6)
    f1 = 1.0 / jnp.sqrt(jnp.float32(fc1_size))
    f2 = 1.0 / jnp.sqrt(jnp.float32(fc2_size))
    f3 = 0.003

    w1 = jax.random.uniform(k[0], (num_observations, fc1_size), jnp.float32, -f1, f1)
    b1 = jax.random.uniform(k[1], (1, fc1_size), jnp.float32, -f1, f1)
    g1 = jnp.ones((1, fc1_size), jnp.float32)
    be1 = jnp.zeros((1, fc1_size), jnp.float32)

    w2 = jax.random.uniform(k[2], (fc1_size, fc2_size), jnp.float32, -f2, f2)
    b2 = jax.random.uniform(k[3], (1, fc2_size), jnp.float32, -f2, f2)
    g2 = jnp.ones((1, fc2_size), jnp.float32)
    be2 = jnp.zeros((1, fc2_size), jnp.float32)

    w3 = jax.random.uniform(k[4], (fc2_size, num_actions), jnp.float32, -f3, f3)
    b3 = jax.random.uniform(k[5], (1, num_actions), jnp.float32, -f3, f3)

    return (w1, b1, g1, be1, w2, b2, g2, be2, w3, b3)


def prepare_params(params, num_observations, num_actions,
                   fc1_size=400, fc2_size=300):
    """Pad features to 128-multiples, cast weights to bf16, stack LN params."""
    (w1, b1, g1, be1, w2, b2, g2, be2, w3, b3) = params
    F1 = _round_up(fc1_size, 128)                  # 400 -> 512
    F2 = _round_up(fc2_size, 128)                  # 300 -> 384
    A = _round_up(max(num_actions, 128), 128)      # 8   -> 128 (lane-dense out)

    def pad2(a, rows, cols):
        return jnp.pad(a, ((0, rows - a.shape[0]), (0, cols - a.shape[1])))

    # Stack (bias, gamma, beta) per LN layer into one resident (3, F) array.
    # gamma/beta pad lanes = 0 -> hidden pad lanes stay exactly 0.
    aux1 = jnp.concatenate([pad2(b1, 1, F1), pad2(g1, 1, F1), pad2(be1, 1, F1)], axis=0)
    aux2 = jnp.concatenate([pad2(b2, 1, F2), pad2(g2, 1, F2), pad2(be2, 1, F2)], axis=0)

    arrays = (
        pad2(w1, num_observations, F1).astype(jnp.bfloat16),
        aux1,
        pad2(w2, F1, F2).astype(jnp.bfloat16),
        aux2,
        pad2(w3, F2, A).astype(jnp.bfloat16),
        pad2(b3, 1, A),
    )
    return dict(arrays=arrays,
                f1_true=float(fc1_size),
                f2_true=float(fc2_size),
                num_actions=num_actions,
                act_pad=A)


def _max_batch_tile():
    """Generation-aware batch-tile cap: v5e prefers <=256 (1 vst slot, no bf16
    VPU); v6e/v7x can take 512.  Falls back to the conservative 256."""
    max_tb = 256
    try:
        info = pltpu.get_tpu_info()
        name = str(getattr(info, "chip_version", getattr(info, "chip_name", ""))).lower()
        if name and "v5" not in name:
            max_tb = 512
    except Exception:
        pass
    return max_tb


def _choose_batch_tiling(B, max_tb):
    """Pick (TB, Bp) so that TB is 16-aligned, padding is small, and the grid
    has >= 2 steps whenever there is more than one tile of work (so the
    'parallel' axis actually shards across v7x's two TensorCores)."""
    Ba = _round_up(max(B, TB_ALIGN), TB_ALIGN)
    if Ba <= TB_ALIGN:
        return TB_ALIGN, TB_ALIGN                       # tiny batch: single step
    if Ba <= 2 * max_tb:
        tb = _round_up((Ba + 1) // 2, TB_ALIGN)          # exactly 2 steps
        return tb, 2 * tb
    best_tb, best_bp = None, None
    for cand in (128, 256, 512):
        if cand > max_tb:
            continue
        bp = _round_up(Ba, cand)
        if best_bp is None or (bp, -cand) < (best_bp, -best_tb):
            best_tb, best_bp = cand, bp
    return best_tb, best_bp


def actor_forward(obs, kparams):
    """obs: (B, num_observations) f32 -> (B, num_actions) f32."""
    arrays = kparams["arrays"]
    num_actions = kparams["num_actions"]
    act_pad = kparams["act_pad"]

    B, D = obs.shape
    TB, Bp = _choose_batch_tiling(B, _max_batch_tile())
    if Bp != B:
        obs = jnp.pad(obs, ((0, Bp - B), (0, 0)))

    grid = (Bp // TB,)

    def resident_spec(a):
        # Weights / LN params: full-array block, constant index map -> no
        # re-DMA across grid steps (stays resident in VMEM).
        return pl.BlockSpec(a.shape, lambda i: (0, 0))

    kernel = functools.partial(actor_kernel,
                               f1_true=kparams["f1_true"],
                               f2_true=kparams["f2_true"])

    out = pl.pallas_call(
        kernel,
        # bf16 output: the padded (Bp, 128) writeback is the dominant HBM stream.
        out_shape=jax.ShapeDtypeStruct((Bp, act_pad), jnp.bfloat16),
        grid=grid,
        in_specs=[pl.BlockSpec((TB, D), lambda i: (i, 0))]
                 + [resident_spec(a) for a in arrays],
        out_specs=pl.BlockSpec((TB, act_pad), lambda i: (i, 0)),
        compiler_params=pltpu.CompilerParams(
            dimension_semantics=("parallel",)),
    )(obs, *arrays)

    return out[:B, :num_actions].astype(jnp.float32)


def actor_ref(obs, params):
    """Pure-JAX f32 reference (true shapes) for correctness checking."""
    (w1, b1, g1, be1, w2, b2, g2, be2, w3, b3) = params

    def ln(h, g, b):
        mu = jnp.mean(h, axis=-1, keepdims=True)
        var = jnp.mean((h - mu) ** 2, axis=-1, keepdims=True)
        return (h - mu) / jnp.sqrt(var + LN_EPS) * g + b

    h = jnp.maximum(ln(obs @ w1 + b1, g1, be1), 0.0)
    h = jnp.maximum(ln(h @ w2 + b2, g2, be2), 0.0)
    return jnp.tanh(h @ w3 + b3)


if __name__ == "__main__":
    key = jax.random.PRNGKey(0)
    k_obs, k_params = jax.random.split(key)

    batch = 2
    num_observations = 32
    num_actions = 8

    obs = jax.random.normal(k_obs, (batch, num_observations), jnp.float32)
    params = init_params(k_params, num_observations, num_actions,
                         fc1_size=400, fc2_size=300)
    kparams = prepare_params(params, num_observations, num_actions,
                             fc1_size=400, fc2_size=300)

    out = jax.block_until_ready(actor_forward(obs, kparams))
    ref = actor_ref(obs, params)

    assert out.shape == (batch, num_actions), out.shape
    max_err = jnp.max(jnp.abs(out - ref))
    # bf16 weights / activations / output vs f32 reference -> loosened tolerance.
    assert max_err < 1e-2, f"max abs err = {max_err}"

    print("KERNEL_OK")
</pallas_src>

<mosaic_0001>
module attributes {stable_mosaic.version = 11 : i64} {
  func.func @actor_kernel(%arg0: i32, %arg1: memref<16x32xf32, #tpu.memory_space<vmem>>, %arg2: memref<32x512xbf16, #tpu.memory_space<vmem>>, %arg3: memref<3x512xf32, #tpu.memory_space<vmem>>, %arg4: memref<512x384xbf16, #tpu.memory_space<vmem>>, %arg5: memref<3x384xf32, #tpu.memory_space<vmem>>, %arg6: memref<384x128xbf16, #tpu.memory_space<vmem>>, %arg7: memref<1x128xf32, #tpu.memory_space<vmem>>, %arg8: memref<16x128xbf16, #tpu.memory_space<vmem>>) attributes {dimension_semantics = [#tpu.dimension_semantics<parallel>], iteration_bounds = array<i64: 1>, scalar_prefetch = 0 : i64, scratch_operands = 0 : i64, tpu.core_type = #tpu.core_type<tc>, window_params = [{transform_indices = @transform_0, window_bounds = array<i64: 16, 32>}, {pipeline_mode = #tpu.pipeline_mode<synchronous>, transform_indices = @transform_1, window_bounds = array<i64: 32, 512>}, {pipeline_mode = #tpu.pipeline_mode<synchronous>, transform_indices = @transform_2, window_bounds = array<i64: 3, 512>}, {pipeline_mode = #tpu.pipeline_mode<synchronous>, transform_indices = @transform_3, window_bounds = array<i64: 512, 384>}, {pipeline_mode = #tpu.pipeline_mode<synchronous>, transform_indices = @transform_4, window_bounds = array<i64: 3, 384>}, {pipeline_mode = #tpu.pipeline_mode<synchronous>, transform_indices = @transform_5, window_bounds = array<i64: 384, 128>}, {pipeline_mode = #tpu.pipeline_mode<synchronous>, transform_indices = @transform_6, window_bounds = array<i64: 1, 128>}, {transform_indices = @transform_7, window_bounds = array<i64: 16, 128>}]} {
    %c0 = arith.constant 0 : index
    %c0_0 = arith.constant 0 : index
    %0 = vector.load %arg1[%c0, %c0_0] : memref<16x32xf32, #tpu.memory_space<vmem>>, vector<16x32xf32>
    %1 = arith.truncf %0 : vector<16x32xf32> to vector<16x32xbf16>
    %c0_1 = arith.constant 0 : index
    %c0_2 = arith.constant 0 : index
    %2 = vector.load %arg2[%c0_1, %c0_2] : memref<32x512xbf16, #tpu.memory_space<vmem>>, vector<32x512xbf16>
    %cst = arith.constant dense<0.000000e+00> : vector<16x512xf32>
    %3 = tpu.matmul %1, %2, %cst {dimension_numbers = #tpu.dot_dimension_numbers<[1], [0], [0], [1], [0, 0, 1, 1], [], []>} : vector<16x32xbf16>, vector<32x512xbf16>, vector<16x512xf32> -> vector<16x512xf32>
    %c0_3 = arith.constant 0 : index
    %c0_4 = arith.constant 0 : index
    %4 = vector.load %arg3[%c0_3, %c0_4] : memref<3x512xf32, #tpu.memory_space<vmem>>, vector<1x512xf32>
    %5 = vector.broadcast %4 : vector<1x512xf32> to vector<16x512xf32>
    %6 = arith.addf %3, %5 : vector<16x512xf32>
    %c1 = arith.constant 1 : index
    %c0_5 = arith.constant 0 : index
    %7 = vector.load %arg3[%c1, %c0_5] : memref<3x512xf32, #tpu.memory_space<vmem>>, vector<1x512xf32>
    %c2 = arith.constant 2 : index
    %c0_6 = arith.constant 0 : index
    %8 = vector.load %arg3[%c2, %c0_6] : memref<3x512xf32, #tpu.memory_space<vmem>>, vector<1x512xf32>
    %cst_7 = arith.constant dense<0.000000e+00> : vector<16xf32>
    %9 = vector.multi_reduction <add>, %6, %cst_7 [1] : vector<16x512xf32> to vector<16xf32>
    %10 = vector.shape_cast %9 : vector<16xf32> to vector<16x1xf32>
    %11 = arith.mulf %6, %6 : vector<16x512xf32>
    %cst_8 = arith.constant dense<0.000000e+00> : vector<16xf32>
    %12 = vector.multi_reduction <add>, %11, %cst_8 [1] : vector<16x512xf32> to vector<16xf32>
    %13 = vector.shape_cast %12 : vector<16xf32> to vector<16x1xf32>
    %cst_9 = arith.constant 2.500000e-03 : f32
    %14 = vector.broadcast %cst_9 : f32 to vector<16x1xf32>
    %15 = arith.mulf %10, %14 : vector<16x1xf32>
    %cst_10 = arith.constant 2.500000e-03 : f32
    %16 = vector.broadcast %cst_10 : f32 to vector<16x1xf32>
    %17 = arith.mulf %13, %16 : vector<16x1xf32>
    %18 = arith.mulf %15, %15 : vector<16x1xf32>
    %19 = arith.subf %17, %18 : vector<16x1xf32>
    %cst_11 = arith.constant 0.000000e+00 : f32
    %20 = vector.broadcast %cst_11 : f32 to vector<16x1xf32>
    %21 = arith.maximumf %19, %20 : vector<16x1xf32>
    %cst_12 = arith.constant 9.99999974E-6 : f32
    %22 = vector.broadcast %cst_12 : f32 to vector<16x1xf32>
    %23 = arith.addf %21, %22 : vector<16x1xf32>
    %24 = math.rsqrt %23 : vector<16x1xf32>
    %25 = vector.broadcast %15 : vector<16x1xf32> to vector<16x512xf32>
    %26 = arith.subf %6, %25 : vector<16x512xf32>
    %27 = vector.broadcast %24 : vector<16x1xf32> to vector<16x512xf32>
    %28 = arith.mulf %26, %27 : vector<16x512xf32>
    %29 = vector.broadcast %7 : vector<1x512xf32> to vector<16x512xf32>
    %30 = arith.mulf %28, %29 : vector<16x512xf32>
    %31 = vector.broadcast %8 : vector<1x512xf32> to vector<16x512xf32>
    %32 = arith.addf %30, %31 : vector<16x512xf32>
    %cst_13 = arith.constant 0.000000e+00 : f32
    %33 = vector.broadcast %cst_13 : f32 to vector<16x512xf32>
    %34 = arith.maximumf %32, %33 : vector<16x512xf32>
    %35 = arith.truncf %34 : vector<16x512xf32> to vector<16x512xbf16>
    %c0_14 = arith.constant 0 : index
    %c0_15 = arith.constant 0 : index
    %36 = vector.load %arg4[%c0_14, %c0_15] : memref<512x384xbf16, #tpu.memory_space<vmem>>, vector<512x384xbf16>
    %cst_16 = arith.constant dense<0.000000e+00> : vector<16x384xf32>
    %37 = tpu.matmul %35, %36, %cst_16 {dimension_numbers = #tpu.dot_dimension_numbers<[1], [0], [0], [1], [0, 0, 1, 1], [], []>} : vector<16x512xbf16>, vector<512x384xbf16>, vector<16x384xf32> -> vector<16x384xf32>
    %c0_17 = arith.constant 0 : index
    %c0_18 = arith.constant 0 : index
    %38 = vector.load %arg5[%c0_17, %c0_18] : memref<3x384xf32, #tpu.memory_space<vmem>>, vector<1x384xf32>
    %39 = vector.broadcast %38 : vector<1x384xf32> to vector<16x384xf32>
    %40 = arith.addf %37, %39 : vector<16x384xf32>
    %c1_19 = arith.constant 1 : index
    %c0_20 = arith.constant 0 : index
    %41 = vector.load %arg5[%c1_19, %c0_20] : memref<3x384xf32, #tpu.memory_space<vmem>>, vector<1x384xf32>
    %c2_21 = arith.constant 2 : index
    %c0_22 = arith.constant 0 : index
    %42 = vector.load %arg5[%c2_21, %c0_22] : memref<3x384xf32, #tpu.memory_space<vmem>>, vector<1x384xf32>
    %cst_23 = arith.constant dense<0.000000e+00> : vector<16xf32>
    %43 = vector.multi_reduction <add>, %40, %cst_23 [1] : vector<16x384xf32> to vector<16xf32>
    %44 = vector.shape_cast %43 : vector<16xf32> to vector<16x1xf32>
    %45 = arith.mulf %40, %40 : vector<16x384xf32>
    %cst_24 = arith.constant dense<0.000000e+00> : vector<16xf32>
    %46 = vector.multi_reduction <add>, %45, %cst_24 [1] : vector<16x384xf32> to vector<16xf32>
    %47 = vector.shape_cast %46 : vector<16xf32> to vector<16x1xf32>
    %cst_25 = arith.constant 0.00333333341 : f32
    %48 = vector.broadcast %cst_25 : f32 to vector<16x1xf32>
    %49 = arith.mulf %44, %48 : vector<16x1xf32>
    %cst_26 = arith.constant 0.00333333341 : f32
    %50 = vector.broadcast %cst_26 : f32 to vector<16x1xf32>
    %51 = arith.mulf %47, %50 : vector<16x1xf32>
    %52 = arith.mulf %49, %49 : vector<16x1xf32>
    %53 = arith.subf %51, %52 : vector<16x1xf32>
    %cst_27 = arith.constant 0.000000e+00 : f32
    %54 = vector.broadcast %cst_27 : f32 to vector<16x1xf32>
    %55 = arith.maximumf %53, %54 : vector<16x1xf32>
    %cst_28 = arith.constant 9.99999974E-6 : f32
    %56 = vector.broadcast %cst_28 : f32 to vector<16x1xf32>
    %57 = arith.addf %55, %56 : vector<16x1xf32>
    %58 = math.rsqrt %57 : vector<16x1xf32>
    %59 = vector.broadcast %49 : vector<16x1xf32> to vector<16x384xf32>
    %60 = arith.subf %40, %59 : vector<16x384xf32>
    %61 = vector.broadcast %58 : vector<16x1xf32> to vector<16x384xf32>
    %62 = arith.mulf %60, %61 : vector<16x384xf32>
    %63 = vector.broadcast %41 : vector<1x384xf32> to vector<16x384xf32>
    %64 = arith.mulf %62, %63 : vector<16x384xf32>
    %65 = vector.broadcast %42 : vector<1x384xf32> to vector<16x384xf32>
    %66 = arith.addf %64, %65 : vector<16x384xf32>
    %cst_29 = arith.constant 0.000000e+00 : f32
    %67 = vector.broadcast %cst_29 : f32 to vector<16x384xf32>
    %68 = arith.maximumf %66, %67 : vector<16x384xf32>
    %69 = arith.truncf %68 : vector<16x384xf32> to vector<16x384xbf16>
    %c0_30 = arith.constant 0 : index
    %c0_31 = arith.constant 0 : index
    %70 = vector.load %arg6[%c0_30, %c0_31] : memref<384x128xbf16, #tpu.memory_space<vmem>>, vector<384x128xbf16>
    %cst_32 = arith.constant dense<0.000000e+00> : vector<16x128xf32>
    %71 = tpu.matmul %69, %70, %cst_32 {dimension_numbers = #tpu.dot_dimension_numbers<[1], [0], [0], [1], [0, 0, 1, 1], [], []>} : vector<16x384xbf16>, vector<384x128xbf16>, vector<16x128xf32> -> vector<16x128xf32>
    %c0_33 = arith.constant 0 : index
    %c0_34 = arith.constant 0 : index
    %72 = vector.load %arg7[%c0_33, %c0_34] : memref<1x128xf32, #tpu.memory_space<vmem>>, vector<1x128xf32>
    %73 = vector.broadcast %72 : vector<1x128xf32> to vector<16x128xf32>
    %74 = arith.addf %71, %73 : vector<16x128xf32>
    %75 = math.tanh %74 : vector<16x128xf32>
    %76 = arith.truncf %75 : vector<16x128xf32> to vector<16x128xbf16>
    %c0_35 = arith.constant 0 : index
    %c0_36 = arith.constant 0 : index
    %77 = vector.load %arg8[%c0_35, %c0_36] : memref<16x128xbf16, #tpu.memory_space<vmem>>, vector<16x128xbf16>
    tpu.vector_store %arg8[%c0_35, %c0_36], %76 {strides = array<i32>} : memref<16x128xbf16, #tpu.memory_space<vmem>>, vector<16x128xbf16>,
    return
  }
  func.func @transform_0(%arg0: i32) -> (i32, i32) {
    %c0_i32 = arith.constant 0 : i32
    %c0_i32_0 = arith.constant 0 : i32
    return %arg0, %c0_i32 : i32, i32
  }
  func.func @transform_1(%arg0: i32) -> (i32, i32) {
    %c0_i32 = arith.constant 0 : i32
    %c0_i32_0 = arith.constant 0 : i32
    %c0_i32_1 = arith.constant 0 : i32
    return %c0_i32, %c0_i32_0 : i32, i32
  }
  func.func @transform_2(%arg0: i32) -> (i32, i32) {
    %c0_i32 = arith.constant 0 : i32
    %c0_i32_0 = arith.constant 0 : i32
    %c0_i32_1 = arith.constant 0 : i32
    return %c0_i32, %c0_i32_0 : i32, i32
  }
  func.func @transform_3(%arg0: i32) -> (i32, i32) {
    %c0_i32 = arith.constant 0 : i32
    %c0_i32_0 = arith.constant 0 : i32
    %c0_i32_1 = arith.constant 0 : i32
    return %c0_i32, %c0_i32_0 : i32, i32
  }
  func.func @transform_4(%arg0: i32) -> (i32, i32) {
    %c0_i32 = arith.constant 0 : i32
    %c0_i32_0 = arith.constant 0 : i32
    %c0_i32_1 = arith.constant 0 : i32
    return %c0_i32, %c0_i32_0 : i32, i32
  }
  func.func @transform_5(%arg0: i32) -> (i32, i32) {
    %c0_i32 = arith.constant 0 : i32
    %c0_i32_0 = arith.constant 0 : i32
    %c0_i32_1 = arith.constant 0 : i32
    return %c0_i32, %c0_i32_0 : i32, i32
  }
  func.func @transform_6(%arg0: i32) -> (i32, i32) {
    %c0_i32 = arith.constant 0 : i32
    %c0_i32_0 = arith.constant 0 : i32
    %c0_i32_1 = arith.constant 0 : i32
    return %c0_i32, %c0_i32_0 : i32, i32
  }
  func.func @transform_7(%arg0: i32) -> (i32, i32) {
    %c0_i32 = arith.constant 0 : i32
    %c0_i32_0 = arith.constant 0 : i32
    return %arg0, %c0_i32 : i32, i32
  }
}

</mosaic_0001>

<bundles_post_ra>
// kernel: tpu_custom_call.1
= control target key start
LH: loop header
LB: loop body
LE: loop exit
PB: predicated region body
PF: predicated region fallthrough
CT: control target
= control target key end

     0   :  { %12 = vsyncpa [#allocation3], 0  ;;  %s2626_s0 = inlined_call_operand.hbm [shape: f32[16,32], index: 0, kind: input, shape index: {}]   ;;  %s2627_s1 = inlined_call_operand.hbm [shape: bf16[32,512], index: 1, kind: input, shape index: {}]   ;;  %s2628_s2 = inlined_call_operand.hbm [shape: f32[3,512], index: 2, kind: input, shape index: {}]   ;;  %s2629_s3 = inlined_call_operand.hbm [shape: bf16[512,384], index: 3, kind: input, shape index: {}]   ;;  %s2630_s4 = inlined_call_operand.hbm [shape: f32[3,384], index: 4, kind: input, shape index: {}]   ;;  %s2631_s5 = inlined_call_operand.hbm [shape: bf16[384,128], index: 5, kind: input, shape index: {}]   ;;  %s2632_s6 = inlined_call_operand.vmem [shape: f32[1,128], index: 6, kind: input, shape index: {}]   ;;  %s2633_s7 = inlined_call_operand.hbm [shape: bf16[16,128], index: 7, kind: output, shape index: {}]  }
   0x1   :  { %13 = vsyncpa [#allocation6], 0 }
   0x2   :  { %14 = vsyncpa [#allocation9], 0 }
   0x3   :  { %15 = vsyncpa [#allocation12], 0  ;;  %s34_s26 = sshll.u32 %s2627_s1, 4  ;;  %s35_s26 = int_to_ptr.hbm [resolvable:$true] %s34_s26 }
   0x4   :  { %16 = vsyncpa [#allocation4], 0  ;;  %s2407_s27 = smov [#allocation5]   ;;  %s58_s8 = sshll.u32 %s2629_s3, 4  ;;  %s59_s8 = int_to_ptr.hbm [resolvable:$true] %s58_s8 }
   0x5   :  { %s36_s28 = sshll.u32 %s2407_s27, 4  ;;  %s2408_s9 = smov 256   ;;  %s37_s28 = int_to_ptr.vmem [resolvable:$true] %s36_s28 }
   0x6   :  { %s2409_s10 = smov 16   ;;  %s2410_s11 = smov [#allocation8]  }
   0x7   :  { %42 = dma.hbm_to_vmem [thread:$0]  %s35_s26, 1024, %s37_s28, [#allocation6], %s2408_s9, %s2408_s9, %s2409_s10  }
   0x8   :  { %s60_s12 = sshll.u32 %s2410_s11, 4  ;;  %s2411_s13 = smov 192   ;;  %s61_s12 = int_to_ptr.vmem [resolvable:$true] %s60_s12 }
   0x9   :  { %s2412_s14 = smov 12   ;;  %s21_s16 = sshll.u32 %s2626_s0, 4  ;;  %s22_s16 = int_to_ptr.hbm [resolvable:$true] %s21_s16 }
   0xa   :  { %66 = dma.hbm_to_vmem [thread:$0]  %s59_s8, 12288, %s61_s12, [#allocation9], %s2411_s13, %s2411_s13, %s2412_s14  }
   0xb   :  { %s2413_s17 = smov [#allocation2]   ;;  %s48_s20 = sshll.u32 %s2628_s2, 4  ;;  %s49_s20 = int_to_ptr.hbm [resolvable:$true] %s48_s20 }
   0xc   :  { %s23_s18 = sshll.u32 %s2413_s17, 4  ;;  %s2414_s21 = smov 128   ;;  %s24_s18 = int_to_ptr.vmem [resolvable:$true] %s23_s18 }
   0xd   :  { %s2415_s22 = smov 8   ;;  %s2416_s23 = smov [#allocation7]  }
   0xe   :  { %29 = dma.hbm_to_vmem [thread:$0]  %s22_s16, 256, %s24_s18, [#allocation3], %s2414_s21, %s2414_s21, %s2415_s22  }
   0xf   :  { %s50_s24 = sshll.u32 %s2416_s23, 4  ;;  %s72_s27 = sshll.u32 %s2630_s4, 4  ;;  %s51_s24 = int_to_ptr.vmem [resolvable:$true] %s50_s24  ;;  %s73_s27 = int_to_ptr.hbm [resolvable:$true] %s72_s27 }
  0x10   :  { %53 = dma.hbm_to_vmem [thread:$0]  %s49_s20, 256, %s51_s24, [#allocation6]  }
  0x11   :  { %s82_s29 = sshll.u32 %s2631_s5, 4  ;;  %s2417_s30 = smov [#allocation10]   ;;  %s83_s29 = int_to_ptr.hbm [resolvable:$true] %s82_s29 }
  0x12   :  { %s74_s8 = sshll.u32 %s2417_s30, 4  ;;  %s2418_s2 = smov [#allocation11]   ;;  %s75_s8 = int_to_ptr.vmem [resolvable:$true] %s74_s8 }
  0x13   :  { %77 = dma.hbm_to_vmem [thread:$0]  %s73_s27, 192, %s75_s8, [#allocation9]  }
  0x14   :  { %s84_s9 = sshll.u32 %s2418_s2, 4  ;;  %s2419_s10 = smov 64   ;;  %s85_s9 = int_to_ptr.vmem [resolvable:$true] %s84_s9 }
  0x15   :  { %s2420_s11 = smov 4  }
  0x16   :  { %90 = dma.hbm_to_vmem [thread:$0]  %s83_s29, 3072, %s85_s9, [#allocation12], %s2419_s10, %s2419_s10, %s2420_s11  }
  0x17   :  { %2397 = dma.done.wait [#allocation3], 256  }
  0x18   :  { %2398 = vsyncadd [#allocation3], 4294967040 }
  0x19   :  { %2399 = dma.done.wait [#allocation6], 1280  }
  0x1a   :  { %2400 = vsyncadd [#allocation6], 4294966016 }
  0x1b   :  { %2401 = dma.done.wait [#allocation9], 12480  }
  0x1c   :  { %2402 = vsyncadd [#allocation9], 4294954816 }
  0x1d   :  { %2403 = dma.done.wait [#allocation12], 3072  }
  0x1e   :  { %2404 = vsyncadd [#allocation12], 4294964224  ;;  %v1570_v0 = vld [vmem:[#allocation5 + $0x20] sm:$0xf]  ;;  %v2074_v1 = vld [vmem:[#allocation5 + $0x2c] sm:$0xf0] }
  0x1f   :  { %v1578_v2 = vld [vmem:[#allocation5 + $0x28] sm:$0xf]  ;;  %v1571_v3 = vor.u32 %v2074_v1, %v1570_v0  ;;  %v2075_v4 = vld [vmem:[#allocation5 + $0x34] sm:$0xf0]  ;;  %v1554_v5 = vld [vmem:[#allocation5] sm:$0xf] }
  0x20   :  { %v2070_v6 = vld [vmem:[#allocation5 + $0xc] sm:$0xf0]  ;;  %v1579_v7 = vor.u32 %v2075_v4, %v1578_v2  ;;  %v2072_v8 = vld [vmem:[#allocation5 + $0x24] sm:$0xf]  ;;  %v1572_v9 = vld [vmem:[#allocation5 + $0x30] sm:$0xf0] }
  0x21   :  { %v1562_v10 = vld [vmem:[#allocation5 + $0x8] sm:$0xf]  ;;  %189 = vmatpush.bf16.msra.mxu3 %v1571_v3  ;;  %v1555_v11 = vor.u32 %v2070_v6, %v1554_v5  ;;  %v1575_v12 = vor.u32 %v2072_v8, %v1572_v9  ;;  %v2071_v13 = vld [vmem:[#allocation5 + $0x14] sm:$0xf0]  ;;  %v118_v14 = vld [vmem:[#allocation2] sm:$0xff]  ;;  %vm179_vm0 = vcmask 261120  }
  0x22   :  { %v119_v15 = vld [vmem:[#allocation2 + $0x8] sm:$0xff]  ;;  %217 = vmatpush.bf16.msra.mxu2 %v1579_v7  ;;  %v1563_v16 = vor.u32 %v2071_v13, %v1562_v10  ;;  %v2073_v17 = vld [vmem:[#allocation5 + $0x2c] sm:$0xf]  ;;  %v2068_v19 = vld [vmem:[#allocation5 + $0x4] sm:$0xf]  ;;  %s2421_s12 = smov [#allocation13]  }
  0x23   :  { %v1580_v18 = vld [vmem:[#allocation5 + $0x38] sm:$0xf0]  ;;  %203 = vmatpush.bf16.msra.mxu1 %v1575_v12  ;;  %v1556_v21 = vld [vmem:[#allocation5 + $0x10] sm:$0xf0]  ;;  %v2069_v22 = vld [vmem:[#allocation5 + $0xc] sm:$0xf]  ;;  %v120_v24 = vpack.c.bf16 %v119_v15, %v118_v14 }
  0x24   :  { %v1583_v20 = vor.u32 %v2073_v17, %v1580_v18  ;;  %v1564_v23 = vld [vmem:[#allocation5 + $0x18] sm:$0xf0]  ;;  %v1559_v25 = vor.u32 %v2068_v19, %v1556_v21  ;;  %v2483_v27 = vld [vmem:[#allocation7] ss:$4 sm:$0xf]  ;;  %s1534_s13 = sshll.u32 %s2421_s12, 4  ;;  %s1535_s13 = int_to_ptr.vmem [resolvable:$true] %s1534_s13 }
  0x25   :  { %190 = vmatpush.bf16.msra.mxu3 %v1555_v11  ;;  %v1567_v26 = vor.u32 %v2069_v22, %v1564_v23  ;;  %v131_v28 = vperm.slane %v2483_v27, 0  ;;  %v132_v29 = vperm.slane %v2483_v27, 1  ;;  %v133_v30 = vperm.slane %v2483_v27, 2  ;;  %v1674_v31 = vld [vmem:[#allocation8 + $0xa8] sm:$0xf]  ;;  %s1536_s15 = sshll.u32 %s2633_s7, 4  ;;  %s1537_s15 = int_to_ptr.hbm [resolvable:$true] %s1536_s15 }
  0x26   :  { %218 = vmatpush.bf16.msra.mxu2 %v1563_v16  ;;  %v2098_v32 = vld [vmem:[#allocation8 + $0xb0] sm:$0xf0]  ;;  %v1770_v33 = vld [vmem:[#allocation8 + $0x168] sm:$0xf]  ;;  %v1662_v44 = vld [vmem:[#allocation8 + $0x90] sm:$0xf] }
  0x27   :  { %204 = vmatpush.bf16.msra.mxu1 %v1559_v25  ;;  %v1675_v35 = vor.u32 %v2098_v32, %v1674_v31  ;;  %v2122_v36 = vld [vmem:[#allocation8 + $0x170] sm:$0xf0]  ;;  %v1866_v37 = vld [vmem:[#allocation8 + $0x228] sm:$0xf]  ;;  %v2095_v46 = vld [vmem:[#allocation8 + $0x98] sm:$0xf0] }
  0x28   :  { %1584 = vmatmul.msk.bf16.vlgmr.msra.gmra.mxu3 %vm179_vm0, %v120_v24  ;;  %v2146_v38 = vld [vmem:[#allocation8 + $0x230] sm:$0xf0]  ;;  %v1771_v40 = vor.u32 %v2122_v36, %v1770_v33  ;;  %v1962_v42 = vld [vmem:[#allocation8 + $0x2e8] sm:$0xf]  ;;  %v1758_v47 = vld [vmem:[#allocation8 + $0x150] sm:$0xf]  ;;  %v1663_v49 = vor.u32 %v2095_v46, %v1662_v44 }
  0x29   :  { %231 = vmatpush.bf16.msrb.mxu3 %v1583_v20  ;;  %1586 = vmatmul.msk.bf16.vlgmr.msra.gmra.mxu2 %vm179_vm0, %v120_v24  ;;  %v1867_v41 = vor.u32 %v2146_v38, %v1866_v37  ;;  %v2170_v43 = vld [vmem:[#allocation8 + $0x2f0] sm:$0xf0]  ;;  %v2119_v48 = vld [vmem:[#allocation8 + $0x158] sm:$0xf0]  ;;  %v1854_v50 = vld [vmem:[#allocation8 + $0x210] sm:$0xf] }
  0x2a   :  { %1585 = vmatmul.msk.bf16.vlgmr.msra.gmra.mxu1 %vm179_vm0, %v120_v24  ;;  %1013 = vmatpush.bf16.msra.mxu0 %v1675_v35  ;;  %v1963_v45 = vor.u32 %v2170_v43, %v1962_v42  ;;  %v2143_v51 = vld [vmem:[#allocation8 + $0x218] sm:$0xf0]  ;;  %v1950_v52 = vld [vmem:[#allocation8 + $0x2d0] sm:$0xf]  ;;  %v1759_v53 = vor.u32 %v2119_v48, %v1758_v47  ;;  %v1650_v56 = vld [vmem:[#allocation8 + $0x78] sm:$0xf] }
  0x2b   :  { %1027 = vmatpush.bf16.msrb.mxu1 %v1771_v40  ;;  %1041 = vmatpush.bf16.msrb.mxu2 %v1867_v41  ;;  %v1855_v54 = vor.u32 %v2143_v51, %v1854_v50  ;;  %v2167_v55 = vld [vmem:[#allocation8 + $0x2d8] sm:$0xf0]  ;;  %v2092_v57 = vld [vmem:[#allocation8 + $0x80] sm:$0xf0]  ;;  %v1746_v59 = vld [vmem:[#allocation8 + $0x138] sm:$0xf] }
  0x2c   :  { %v1951_v58 = vor.u32 %v2167_v55, %v1950_v52  ;;  %v2116_v60 = vld [vmem:[#allocation8 + $0x140] sm:$0xf0]  ;;  %v1842_v61 = vld [vmem:[#allocation8 + $0x1f8] sm:$0xf]  ;;  %v1651_v1 = vor.u32 %v2092_v57, %v1650_v56  ;;  %v134_v13 = vperm.slane %v2483_v27, 3 }
  0x2d   :  { %232 = vmatpush.bf16.msrb.mxu3 %v1567_v26  ;;  %v2140_v2 = vld [vmem:[#allocation8 + $0x200] sm:$0xf0]  ;;  %v1938_v3 = vld [vmem:[#allocation8 + $0x2b8] sm:$0xf]  ;;  %v1747_v5 = vor.u32 %v2116_v60, %v1746_v59  ;;  %v1638_v40 = vld [vmem:[#allocation8 + $0x60] sm:$0xf] }
  0x2e   :  { %1014 = vmatpush.bf16.msra.mxu0 %v1663_v49  ;;  %v2164_v4 = vld [vmem:[#allocation8 + $0x2c0] sm:$0xf0]  ;;  %v1843_v6 = vor.u32 %v2140_v2, %v1842_v61  ;;  %v2089_v41 = vld [vmem:[#allocation8 + $0x68] sm:$0xf0]  ;;  %v1734_v42 = vld [vmem:[#allocation8 + $0x120] sm:$0xf] }
  0x2f   :  { %1028 = vmatpush.bf16.msrb.mxu1 %v1759_v53  ;;  %1042 = vmatpush.bf16.msrb.mxu2 %v1855_v54  ;;  %v1939_v8 = vor.u32 %v2164_v4, %v1938_v3  ;;  %v1639_v43 = vor.u32 %v2089_v41, %v1638_v40  ;;  %v2113_v44 = vld [vmem:[#allocation8 + $0x128] sm:$0xf0]  ;;  %v1926_v49 = vld [vmem:[#allocation8 + $0x2a0] sm:$0xf]  ;;  %v1626_v52 = vld [vmem:[#allocation8 + $0x48] sm:$0xf] }
  0x30   :  { %v2137_v46 = vld [vmem:[#allocation8 + $0x1e8] sm:$0xf0]  ;;  %v1735_v47 = vor.u32 %v2113_v44, %v1734_v42  ;;  %v2086_v53 = vld [vmem:[#allocation8 + $0x50] sm:$0xf0]  ;;  %v1722_v54 = vld [vmem:[#allocation8 + $0x108] sm:$0xf] }
  0x31   :  { %1055 = vmatpush.bf16.msra.mxu3 %v1963_v45  ;;  %v1830_v45 = vld [vmem:[#allocation8 + $0x1e0] sm:$0xf]  ;;  %v2161_v50 = vld [vmem:[#allocation8 + $0x2a8] sm:$0xf0]  ;;  %v1627_v55 = vor.u32 %v2086_v53, %v1626_v52  ;;  %v2110_v56 = vld [vmem:[#allocation8 + $0x110] sm:$0xf0] }
  0x32   :  { %1015 = vmatpush.bf16.msra.mxu0 %v1651_v1  ;;  %v1831_v48 = vor.u32 %v2137_v46, %v1830_v45  ;;  %v1927_v51 = vor.u32 %v2161_v50, %v1926_v49  ;;  %v1818_v57 = vld [vmem:[#allocation8 + $0x1c8] sm:$0xf]  ;;  %v1723_v59 = vor.u32 %v2110_v56, %v1722_v54  ;;  %v1614_v2 = vld [vmem:[#allocation8 + $0x30] sm:$0xf]  ;;  %v2083_v3 = vld [vmem:[#allocation8 + $0x38] sm:$0xf0] }
  0x33   :  { %1029 = vmatpush.bf16.msrb.mxu1 %v1747_v5  ;;  %1043 = vmatpush.bf16.msrb.mxu2 %v1843_v6  ;;  %v1914_v61 = vld [vmem:[#allocation8 + $0x288] sm:$0xf]  ;;  %v1710_v4 = vld [vmem:[#allocation8 + $0xf0] sm:$0xf]  ;;  %v1615_v5 = vor.u32 %v2083_v3, %v1614_v2  ;;  %v2107_v6 = vld [vmem:[#allocation8 + $0xf8] sm:$0xf0] }
  0x34   :  { %v1878_v41 = vld [vmem:[#allocation8 + $0x240] sm:$0xf]  ;;  %v2149_v42 = vld [vmem:[#allocation8 + $0x248] sm:$0xf0]  ;;  %v1676_v45 = vld [vmem:[#allocation8 + $0xb4] sm:$0xf0] }
  0x35   :  { %1056 = vmatpush.bf16.msra.mxu3 %v1951_v58  ;;  %v2134_v58 = vld [vmem:[#allocation8 + $0x1d0] sm:$0xf0]  ;;  %v1879_v44 = vor.u32 %v2149_v42, %v1878_v41  ;;  %v2121_v46 = vld [vmem:[#allocation8 + $0x16c] sm:$0xf]  ;;  %v1964_v54 = vld [vmem:[#allocation8 + $0x2f4] sm:$0xf0] }
  0x36   :  { %1016 = vmatpush.bf16.msra.mxu0 %v1639_v43  ;;  %v1819_v60 = vor.u32 %v2134_v58, %v1818_v57  ;;  %v2097_v43 = vld [vmem:[#allocation8 + $0xac] sm:$0xf]  ;;  %v1664_v56 = vld [vmem:[#allocation8 + $0x9c] sm:$0xf0]  ;;  %v2166_v2 = vld [vmem:[#allocation8 + $0x2d4] sm:$0xf] }
  0x37   :  { %1030 = vmatpush.bf16.msrb.mxu1 %v1735_v47  ;;  %1044 = vmatpush.bf16.msrb.mxu2 %v1831_v48  ;;  %v1772_v47 = vld [vmem:[#allocation8 + $0x174] sm:$0xf0]  ;;  %v1679_v48 = vor.u32 %v2097_v43, %v1676_v45  ;;  %v2145_v50 = vld [vmem:[#allocation8 + $0x22c] sm:$0xf]  ;;  %v1952_v3 = vld [vmem:[#allocation8 + $0x2dc] sm:$0xf0] }
  0x38   :  { %1587 = vmatmul.msk.bf16.vlgmr.msrb.gmra.mxu3 %vm179_vm0, %v120_v24  ;;  %v1775_v49 = vor.u32 %v2121_v46, %v1772_v47  ;;  %v2169_v52 = vld [vmem:[#allocation8 + $0x2ec] sm:$0xf]  ;;  %v1724_v43 = vld [vmem:[#allocation8 + $0x114] sm:$0xf0] }
  0x39   :  { %1057 = vmatpush.bf16.msra.mxu3 %v1939_v8  ;;  %v2131_v8 = vld [vmem:[#allocation8 + $0x1b8] sm:$0xf0]  ;;  %v1967_v57 = vor.u32 %v2169_v52, %v1964_v54  ;;  %v2109_v42 = vld [vmem:[#allocation8 + $0x10c] sm:$0xf]  ;;  %v2082_v54 = vld [vmem:[#allocation8 + $0x34] sm:$0xf] }
  0x3a   :  { %1017 = vmatpush.bf16.msra.mxu0 %v1627_v55  ;;  %v2094_v55 = vld [vmem:[#allocation8 + $0x94] sm:$0xf]  ;;  %v1727_v47 = vor.u32 %v2109_v42, %v1724_v43  ;;  %v2148_v42 = vld [vmem:[#allocation8 + $0x244] sm:$0xf]  ;;  %v1880_v43 = vld [vmem:[#allocation8 + $0x24c] sm:$0xf0] }
  0x3b   :  { %1031 = vmatpush.bf16.msrb.mxu1 %v1723_v59  ;;  %1045 = vmatpush.bf16.msrb.mxu2 %v1819_v60  ;;  %v1667_v58 = vor.u32 %v2094_v55, %v1664_v56  ;;  %v2118_v59 = vld [vmem:[#allocation8 + $0x154] sm:$0xf]  ;;  %v1760_v60 = vld [vmem:[#allocation8 + $0x15c] sm:$0xf0] }
  0x3c   :  { %v1616_v55 = vld [vmem:[#allocation8 + $0x3c] sm:$0xf0]  ;;  %v2106_v56 = vld [vmem:[#allocation8 + $0xf4] sm:$0xf] }
  0x3d   :  { %1058 = vmatpush.bf16.msra.mxu3 %v1927_v51  ;;  %v1868_v51 = vld [vmem:[#allocation8 + $0x234] sm:$0xf0] }
  0x3e   :  { %1018 = vmatpush.bf16.msra.mxu0 %v1615_v5  ;;  %v1871_v53 = vor.u32 %v2145_v50, %v1868_v51  ;;  %v1955_v5 = vor.u32 %v2166_v2, %v1952_v3  ;;  %v1916_v51 = vld [vmem:[#allocation8 + $0x294] sm:$0xf0]  ;;  %v2154_v2 = vld [vmem:[#allocation8 + $0x274] sm:$0xf]  ;;  %v1904_v3 = vld [vmem:[#allocation8 + $0x27c] sm:$0xf0] }
  0xa7   :  { %v206_v39 = vpop.f32.mrf.mxu1 }
  0xa8   :  { %v2492_v63 = vadd.f32 %v206_v39, %v132_v29 }
  0xaa   :  { %v254_v10 = vmul.f32 %v2492_v63, %v2492_v63 }
  0xab   :  { %v192_v34 = vpop.f32.mrf.mxu3 }
  0xac   :  { %v2490_v62 = vadd.f32 %v192_v34, %v131_v28  ;;  %v220_v0 = vpop.f32.mrf.mxu2 }
  0xad   :  { %v2500_v11 = vadd.f32 %v220_v0, %v133_v30  ;;  %v2158_v0 = vld [vmem:[#allocation8 + $0x290] sm:$0xf0] }
  0xae   :  { %v253_v9 = vmul.f32 %v2490_v62, %v2490_v62  ;;  %v243_v14 = vadd.f32 %v2492_v63, %v2490_v62  ;;  %v1915_v1 = vor.u32 %v2158_v0, %v1914_v61  ;;  %v2142_v61 = vld [vmem:[#allocation8 + $0x214] sm:$0xf]  ;;  %v1763_v0 = vor.u32 %v2118_v59, %v1760_v60  ;;  %v1808_v60 = vld [vmem:[#allocation8 + $0x1bc] sm:$0xf0] }
  0xaf   :  { %v208_v12 = vpop.f32.mrf.mxu1  ;;  %v255_v16 = vmul.f32 %v2500_v11, %v2500_v11  ;;  %v2130_v59 = vld [vmem:[#allocation8 + $0x1b4] sm:$0xf] }
  0xb0   :  { %v2505_v15 = vadd.f32 %v208_v12, %v132_v29  ;;  %v261_v17 = vadd.f32 %v254_v10, %v253_v9  ;;  %v244_v22 = vadd.f32 %v243_v14, %v2500_v11  ;;  %1059 = vmatpush.bf16.msra.mxu3 %v1915_v1  ;;  %v1711_v9 = vor.u32 %v2107_v6, %v1710_v4  ;;  %v1902_v12 = vld [vmem:[#allocation8 + $0x270] sm:$0xf]  ;;  %v1856_v1 = vld [vmem:[#allocation8 + $0x21c] sm:$0xf0]  ;;  %v2091_v6 = vld [vmem:[#allocation8 + $0x7c] sm:$0xf] }
  0xb1   :  { %v1859_v4 = vor.u32 %v2142_v61, %v1856_v1  ;;  %v1811_v1 = vor.u32 %v2130_v59, %v1808_v60 }
  0xb2   :  { %v258_v23 = vmul.f32 %v2505_v15, %v2505_v15  ;;  %v262_v24 = vadd.f32 %v261_v17, %v255_v16  ;;  %1032 = vmatpush.bf16.msrb.mxu1 %v1711_v9  ;;  %v1602_v16 = vld [vmem:[#allocation8 + $0x18] sm:$0xf]  ;;  %v2080_v17 = vld [vmem:[#allocation8 + $0x20] sm:$0xf0] }
  0xb3   :  { %v194_v7 = vpop.f32.mrf.mxu3 }
  0xb4   :  { %v2511_v18 = vadd.f32 %v194_v7, %v131_v28  ;;  %v222_v19 = vpop.f32.mrf.mxu2  ;;  %v1806_v7 = vld [vmem:[#allocation8 + $0x1b0] sm:$0xf] }
  0xb5   :  { %v2522_v26 = vadd.f32 %v222_v19, %v133_v30  ;;  %v1807_v10 = vor.u32 %v2131_v8, %v1806_v7  ;;  %v1698_v19 = vld [vmem:[#allocation8 + $0xd8] sm:$0xf]  ;;  %v1652_v7 = vld [vmem:[#allocation8 + $0x84] sm:$0xf0]  ;;  %v2115_v8 = vld [vmem:[#allocation8 + $0x13c] sm:$0xf] }
  0xb6   :  { %v257_v25 = vmul.f32 %v2511_v18, %v2511_v18  ;;  %v248_v31 = vadd.f32 %v2505_v15, %v2511_v18  ;;  %v1655_v9 = vor.u32 %v2091_v6, %v1652_v7  ;;  %v2079_v6 = vld [vmem:[#allocation8 + $0x1c] sm:$0xf]  ;;  %v1604_v7 = vld [vmem:[#allocation8 + $0x24] sm:$0xf0] }
  0xb7   :  { %v259_v33 = vmul.f32 %v2522_v26, %v2522_v26  ;;  %1046 = vmatpush.bf16.msrb.mxu2 %v1807_v10  ;;  %v1748_v10 = vld [vmem:[#allocation8 + $0x144] sm:$0xf0] }
  0xb8   :  { %v266_v34 = vadd.f32 %v258_v23, %v257_v25  ;;  %v249_v27 = vadd.f32 %v248_v31, %v2522_v26  ;;  %v1794_v23 = vld [vmem:[#allocation8 + $0x198] sm:$0xf]  ;;  %v2152_v31 = vld [vmem:[#allocation8 + $0x260] sm:$0xf0] }
  0xba   :  { %v267_v38 = vadd.f32 %v266_v34, %v259_v33  ;;  %v1590_v33 = vld [vmem:[#allocation8] sm:$0xf]  ;;  %v2077_v34 = vld [vmem:[#allocation8 + $0x8] sm:$0xf0] }
  0xbb   :  { %v234_v20 = vpop.f32.mrf.mxu3 }
  0xbc   :  { %v2513_v21 = vadd.f32 %v234_v20, %v134_v13  ;;  %v1603_v20 = vor.u32 %v2080_v17, %v1602_v16  ;;  %v2163_v17 = vld [vmem:[#allocation8 + $0x2bc] sm:$0xf] }
  0xbe   :  { %v245_v28 = vadd.f32 %v244_v22, %v2513_v21  ;;  %v256_v29 = vmul.f32 %v2513_v21, %v2513_v21  ;;  %v2104_v22 = vld [vmem:[#allocation8 + $0xe0] sm:$0xf0]  ;;  %1019 = vmatpush.bf16.msra.mxu0 %v1603_v20 }
  0xbf   :  { %v1699_v25 = vor.u32 %v2104_v22, %v1698_v19  ;;  %v1940_v19 = vld [vmem:[#allocation8 + $0x2c4] sm:$0xf0]  ;;  %v2088_v22 = vld [vmem:[#allocation8 + $0x64] sm:$0xf] }
  0xc0   :  { %246 = vadd.xlane.f32.xlu0 %v245_v28  ;;  %v263_v32 = vadd.f32 %v262_v24, %v256_v29  ;;  %v2128_v24 = vld [vmem:[#allocation8 + $0x1a0] sm:$0xf0]  ;;  %v1890_v29 = vld [vmem:[#allocation8 + $0x258] sm:$0xf]  ;;  %v1943_v20 = vor.u32 %v2163_v17, %v1940_v19  ;;  %v2127_v17 = vld [vmem:[#allocation8 + $0x19c] sm:$0xf] }
  0xc1   :  { %v1795_v28 = vor.u32 %v2128_v24, %v1794_v23  ;;  %1033 = vmatpush.bf16.msrb.mxu1 %v1699_v25  ;;  %v1640_v23 = vld [vmem:[#allocation8 + $0x6c] sm:$0xf0]  ;;  %v2112_v24 = vld [vmem:[#allocation8 + $0x124] sm:$0xf]  ;;  %v1796_v19 = vld [vmem:[#allocation8 + $0x1a4] sm:$0xf0] }
  0xc2   :  { %264 = vadd.xlane.f32.xlu1 %v263_v32  ;;  %v1891_v32 = vor.u32 %v2152_v31, %v1890_v29  ;;  %v1643_v25 = vor.u32 %v2088_v22, %v1640_v23  ;;  %v2136_v29 = vld [vmem:[#allocation8 + $0x1e4] sm:$0xf]  ;;  %v1832_v31 = vld [vmem:[#allocation8 + $0x1ec] sm:$0xf0]  ;;  %v1892_v23 = vld [vmem:[#allocation8 + $0x264] sm:$0xf0] }
  0xc3   :  { %v236_v35 = vpop.f32.mrf.mxu3  ;;  %1047 = vmatpush.bf16.msrb.mxu2 %v1795_v28  ;;  %v1736_v28 = vld [vmem:[#allocation8 + $0x12c] sm:$0xf0] }
  0xc4   :  { %v2531_v36 = vadd.f32 %v236_v35, %v134_v13  ;;  %v2155_v13 = vld [vmem:[#allocation8 + $0x278] sm:$0xf0]  ;;  %v1686_v35 = vld [vmem:[#allocation8 + $0xc0] sm:$0xf] }
  0xc5   :  { %v1903_v14 = vor.u32 %v2155_v13, %v1902_v12  ;;  %v2139_v12 = vld [vmem:[#allocation8 + $0x1fc] sm:$0xf]  ;;  %v1844_v13 = vld [vmem:[#allocation8 + $0x204] sm:$0xf0] }
  0xc6   :  { %v250_v30 = vadd.f32 %v249_v27, %v2531_v36  ;;  %v260_v37 = vmul.f32 %v2531_v36, %v2531_v36  ;;  %v1591_v27 = vor.u32 %v2077_v34, %v1590_v33  ;;  %v1847_v16 = vor.u32 %v2139_v12, %v1844_v13  ;;  %v2160_v34 = vld [vmem:[#allocation8 + $0x2a4] sm:$0xf]  ;;  %v1700_v12 = vld [vmem:[#allocation8 + $0xe4] sm:$0xf0] }
  0xc7   :  { %1060 = vmatpush.bf16.msra.mxu3 %v1903_v14  ;;  %v1751_v14 = vor.u32 %v2115_v8, %v1748_v10  ;;  %v1835_v33 = vor.u32 %v2136_v29, %v1832_v31  ;;  %v2103_v8 = vld [vmem:[#allocation8 + $0xdc] sm:$0xf]  ;;  %v2076_v31 = vld [vmem:[#allocation8 + $0x4] sm:$0xf] }
  0xc8   :  { %251 = vadd.xlane.f32.xlu0 %v250_v30  ;;  %v268_v39 = vadd.f32 %v267_v38, %v260_v37  ;;  %v2101_v30 = vld [vmem:[#allocation8 + $0xc8] sm:$0xf0]  ;;  %v1782_v37 = vld [vmem:[#allocation8 + $0x180] sm:$0xf]  ;;  %1020 = vmatpush.bf16.msra.mxu0 %v1591_v27 }
  0xc9   :  { %v2125_v38 = vld [vmem:[#allocation8 + $0x188] sm:$0xf0] }
  0xca   :  { %269 = vadd.xlane.f32.xlu1 %v268_v39  ;;  %v1687_v39 = vor.u32 %v2101_v30, %v1686_v35  ;;  %v1783_v40 = vor.u32 %v2125_v38, %v1782_v37  ;;  %v1928_v35 = vld [vmem:[#allocation8 + $0x2ac] sm:$0xf0]  ;;  %v2085_v38 = vld [vmem:[#allocation8 + $0x4c] sm:$0xf] }
  0xcb   :  { %1061 = vmatpush.bf16.msra.mxu3 %v1891_v32  ;;  %v1739_v32 = vor.u32 %v2112_v24, %v1736_v28  ;;  %v1931_v30 = vor.u32 %v2160_v34, %v1928_v35  ;;  %v1688_v34 = vld [vmem:[#allocation8 + $0xcc] sm:$0xf0] }
  0xcc   :  { %1034 = vmatpush.bf16.msrb.mxu1 %v1687_v39  ;;  %1048 = vmatpush.bf16.msrb.mxu2 %v1783_v40  ;;  %v1628_v39 = vld [vmem:[#allocation8 + $0x54] sm:$0xf0] }
  0xcd   :  { %1069 = vmatpush.bf16.msrb.mxu0 %v1679_v48  ;;  %v1631_v41 = vor.u32 %v2085_v38, %v1628_v39  ;;  %v1820_v48 = vld [vmem:[#allocation8 + $0x1d4] sm:$0xf0]  ;;  %v2124_v38 = vld [vmem:[#allocation8 + $0x184] sm:$0xf]  ;;  %v1784_v39 = vld [vmem:[#allocation8 + $0x18c] sm:$0xf0] }
  0xcf   :  { %1062 = vmatpush.bf16.msra.mxu3 %v1879_v44  ;;  %v2133_v44 = vld [vmem:[#allocation8 + $0x1cc] sm:$0xf] }
  0xd0   :  { %1083 = vmatpush.bf16.msra.mxu1 %v1775_v49  ;;  %1097 = vmatpush.bf16.msra.mxu2 %v1871_v53  ;;  %v2157_v49 = vld [vmem:[#allocation8 + $0x28c] sm:$0xf]  ;;  %v1823_v50 = vor.u32 %v2133_v44, %v1820_v48 }
  0xd1   :  { %1070 = vmatpush.bf16.msrb.mxu0 %v1667_v58  ;;  %v1919_v53 = vor.u32 %v2157_v49, %v1916_v51  ;;  %v1712_v58 = vld [vmem:[#allocation8 + $0xfc] sm:$0xf0] }
  0xd3   :  { %1111 = vmatpush.bf16.msrb.mxu3 %v1967_v57  ;;  %v1619_v57 = vor.u32 %v2082_v54, %v1616_v55 }
  0xd4   :  { %1084 = vmatpush.bf16.msra.mxu1 %v1763_v0  ;;  %1098 = vmatpush.bf16.msra.mxu2 %v1859_v4  ;;  %v1715_v0 = vor.u32 %v2106_v56, %v1712_v58 }
  0xd5   :  { %1071 = vmatpush.bf16.msrb.mxu0 %v1655_v9 }
  0xd7   :  { %1112 = vmatpush.bf16.msrb.mxu3 %v1955_v5  ;;  %v1907_v5 = vor.u32 %v2154_v2, %v1904_v3 }
  0xd8   :  { %1085 = vmatpush.bf16.msra.mxu1 %v1751_v14  ;;  %1099 = vmatpush.bf16.msra.mxu2 %v1847_v16  ;;  %v1607_v14 = vor.u32 %v2079_v6, %v1604_v7  ;;  %v1703_v16 = vor.u32 %v2103_v8, %v1700_v12 }
  0xd9   :  { %1072 = vmatpush.bf16.msrb.mxu0 %v1643_v25  ;;  %v1799_v25 = vor.u32 %v2127_v17, %v1796_v19 }
  0xdb   :  { %1113 = vmatpush.bf16.msrb.mxu3 %v1943_v20  ;;  %v2151_v20 = vld [vmem:[#allocation8 + $0x25c] sm:$0xf] }
  0xdc   :  { %1086 = vmatpush.bf16.msra.mxu1 %v1739_v32  ;;  %1100 = vmatpush.bf16.msra.mxu2 %v1835_v33  ;;  %v1895_v28 = vor.u32 %v2151_v20, %v1892_v23  ;;  %v1592_v32 = vld [vmem:[#allocation8 + $0xc] sm:$0xf0]  ;;  %v2100_v33 = vld [vmem:[#allocation8 + $0xc4] sm:$0xf] }
  0xdd   :  { %1073 = vmatpush.bf16.msrb.mxu0 %v1631_v41  ;;  %v1787_v41 = vor.u32 %v2124_v38, %v1784_v39  ;;  %v1778_v38 = vld [vmem:[#allocation8 + $0x170] sm:$0xf] }
  0xdf   :  { %1114 = vmatpush.bf16.msrb.mxu3 %v1931_v30  ;;  %v1691_v30 = vor.u32 %v2100_v33, %v1688_v34 }
  0xe0   :  { %1087 = vmatpush.bf16.msra.mxu1 %v1727_v47  ;;  %1101 = vmatpush.bf16.msra.mxu2 %v1823_v50 }
  0xe1   :  { %1074 = vmatpush.bf16.msrb.mxu0 %v1619_v57 }
  0xe3   :  { %1115 = vmatpush.bf16.msrb.mxu3 %v1919_v53 }
  0xe4   :  { %1088 = vmatpush.bf16.msra.mxu1 %v1715_v0  ;;  %1102 = vmatpush.bf16.msra.mxu2 %v1811_v1 }
  0xe5   :  { %1075 = vmatpush.bf16.msrb.mxu0 %v1607_v14 }
  0xe7   :  { %1116 = vmatpush.bf16.msrb.mxu3 %v1907_v5 }
  0xe8   :  { %1089 = vmatpush.bf16.msra.mxu1 %v1703_v16  ;;  %1103 = vmatpush.bf16.msra.mxu2 %v1799_v25 }
  0xeb   :  { %1117 = vmatpush.bf16.msrb.mxu3 %v1895_v28 }
  0xec   :  { %1090 = vmatpush.bf16.msra.mxu1 %v1691_v30  ;;  %1104 = vmatpush.bf16.msra.mxu2 %v1787_v41  ;;  %v2099_v30 = vld [vmem:[#allocation8 + $0xb8] sm:$0xf0]  ;;  %v1874_v41 = vld [vmem:[#allocation8 + $0x230] sm:$0xf] }
 0x133   :  { %v247_v27 = vpop.xlane.xlu0 %246 }
 0x134   :  { %v2537_v37 = vmul.f32 0.0025, %v247_v27  ;;  %v1595_v27 = vor.u32 %v2076_v31, %v1592_v32 }
 0x135   :  { %v265_v40 = vpop.xlane.xlu1 %264 }
 0x136   :  { %v273_v45 = vmul.f32 0.0025, %v265_v40  ;;  %v275_v46 = vmul.f32 %v2537_v37, %v2537_v37  ;;  %1076 = vmatpush.bf16.msrb.mxu0 %v1595_v27  ;;  %v306_v54 = vsub.f32 %v2513_v21, %v2537_v37  ;;  %v303_v56 = vsub.f32 %v2490_v62, %v2537_v37 }
 0x137   :  { %v304_v59 = vsub.f32 %v2492_v63, %v2537_v37  ;;  %v305_v60 = vsub.f32 %v2500_v11, %v2537_v37 }
 0x138   :  { %v277_v52 = vsub.f32 %v273_v45, %v275_v46  ;;  %v1883_v46 = vor.u32 %v2148_v42, %v1880_v43  ;;  %v2147_v42 = vld [vmem:[#allocation8 + $0x238] sm:$0xf0] }
 0x13a   :  { %v279_v61 = vmax.f32 %v277_v52, 0.0  ;;  %1118 = vmatpush.bf16.msrb.mxu3 %v1883_v46  ;;  %v240_v52 = vld [vmem:[#allocation7 + $0x1] ss:$4 sm:$0xf] }
 0x13b   :  { %v252_v4 = vpop.xlane.xlu0 %251  ;;  %v320_v58 = vperm.slane %v240_v52, 0  ;;  %v321_v1 = vperm.slane %v240_v52, 1  ;;  %v322_v2 = vperm.slane %v240_v52, 2  ;;  %v323_v3 = vperm.slane %v240_v52, 3  ;;  %v2171_v52 = vld [vmem:[#allocation8 + $0x2f8] sm:$0xf0] }
 0x13c   :  { %v281_v9 = vadd.f32 1e-05, %v279_v61  ;;  %v2541_v10 = vmul.f32 0.0025, %v252_v4 }
 0x13d   :  { %v270_v13 = vpop.xlane.xlu1 %269  ;;  %v242_v61 = vld [vmem:[#allocation7 + $0x2] ss:$4 sm:$0xf] }
 0x13e   :  { %2217 = vrsqrt.f32 %v281_v9  ;;  %v274_v22 = vmul.f32 0.0025, %v270_v13  ;;  %v276_v24 = vmul.f32 %v2541_v10, %v2541_v10  ;;  %vm289_vm2 = vweird.f32 %v281_v9 }
 0x13f   :  { %v337_v62 = vperm.slane %v242_v61, 0  ;;  %v338_v8 = vperm.slane %v242_v61, 1  ;;  %v339_v12 = vperm.slane %v242_v61, 2  ;;  %v340_v63 = vperm.slane %v242_v61, 3 }
 0x140   :  { %v278_v29 = vsub.f32 %v274_v22, %v276_v24  ;;  %v310_v16 = vsub.f32 %v2531_v36, %v2541_v10  ;;  %v307_v17 = vsub.f32 %v2511_v18, %v2541_v10  ;;  %v308_v19 = vsub.f32 %v2505_v15, %v2541_v10  ;;  %v1682_v18 = vld [vmem:[#allocation8 + $0xb0] sm:$0xf] }
 0x141   :  { %v309_v20 = vsub.f32 %v2522_v26, %v2541_v10  ;;  %v2123_v10 = vld [vmem:[#allocation8 + $0x178] sm:$0xf0]  ;;  %v1875_v61 = vor.u32 %v2147_v42, %v1874_v41 }
 0x142   :  { %v280_v35 = vmax.f32 %v278_v29, 0.0 }
 0x144   :  { %v2218_v40 = vpop.eup %2217  ;;  %v282_v45 = vadd.f32 1e-05, %v280_v35 }
 0x145   :  { %v284_v44 = vmul.f32 %v2218_v40, %v281_v9  ;;  %vm290_vm1 = vweird.f32 %v2218_v40 }
 0x146   :  { %2219 = vrsqrt.f32 %v282_v45  ;;  %vm291_vm3 = vmor %vm289_vm2, %vm290_vm1  ;;  %vm299_vm5 = vweird.f32 %v282_v45 }
 0x147   :  { %v285_v47 = vmul.f32 %v2218_v40, %v284_v44 }
 0x149   :  { %v286_v48 = vmul.f32 0.5, %v285_v47  ;;  %v1970_v47 = vld [vmem:[#allocation8 + $0x2f0] sm:$0xf] }
 0x14b   :  { %v287_v49 = vsub.f32 1.5, %v286_v48 }
 0x14c   :  { %v2220_v50 = vpop.eup %2219 }
 0x14d   :  { %v288_v51 = vmul.f32 %v2218_v40, %v287_v49  ;;  %v294_v53 = vmul.f32 %v2220_v50, %v282_v45  ;;  %vm300_vm4 = vweird.f32 %v2220_v50 }
 0x14e   :  { %vm301_vm6 = vmor %vm299_vm5, %vm300_vm4 }
 0x14f   :  { %v292_v55 = vsel %vm291_vm3, %v2218_v40, %v288_v51  ;;  %v295_v57 = vmul.f32 %v2220_v50, %v294_v53  ;;  %v1683_v53 = vor.u32 %v2099_v30, %v1682_v18 }
 0x150   :  { %v311_v0 = vmul.f32 %v303_v56, %v292_v55  ;;  %v312_v5 = vmul.f32 %v304_v59, %v292_v55  ;;  %v313_v21 = vmul.f32 %v305_v60, %v292_v55  ;;  %v314_v6 = vmul.f32 %v306_v54, %v292_v55  ;;  %v1670_v59 = vld [vmem:[#allocation8 + $0x98] sm:$0xf]  ;;  %v2096_v60 = vld [vmem:[#allocation8 + $0xa0] sm:$0xf0] }
 0x151   :  { %v296_v4 = vmul.f32 0.5, %v295_v57  ;;  %v1779_v54 = vor.u32 %v2123_v10, %v1778_v38  ;;  %v1730_v38 = vld [vmem:[#allocation8 + $0x110] sm:$0xf]  ;;  %v2159_v10 = vld [vmem:[#allocation8 + $0x298] sm:$0xf0] }
 0x152   :  { %v328_v9 = vmul.f32 %v320_v58, %v311_v0  ;;  %v329_v14 = vmul.f32 %v321_v1, %v312_v5  ;;  %v330_v11 = vmul.f32 %v322_v2, %v313_v21  ;;  %v331_v37 = vmul.f32 %v323_v3, %v314_v6  ;;  %v1958_v5 = vld [vmem:[#allocation8 + $0x2d8] sm:$0xf]  ;;  %v2168_v21 = vld [vmem:[#allocation8 + $0x2e0] sm:$0xf0] }
 0x153   :  { %v297_v7 = vsub.f32 1.5, %v296_v4  ;;  %v1971_v0 = vor.u32 %v2171_v52, %v1970_v47  ;;  %v2144_v4 = vld [vmem:[#allocation8 + $0x220] sm:$0xf0]  ;;  %v1671_v6 = vor.u32 %v2096_v60, %v1670_v59  ;;  %v1718_v47 = vld [vmem:[#allocation8 + $0xf8] sm:$0xf] }
 0x154   :  { %v345_v29 = vadd.f32 %v337_v62, %v328_v9  ;;  %v346_v31 = vadd.f32 %v338_v8, %v329_v14  ;;  %v347_v32 = vadd.f32 %v339_v12, %v330_v11  ;;  %v348_v33 = vadd.f32 %v340_v63, %v331_v37  ;;  %v1850_v14 = vld [vmem:[#allocation8 + $0x200] sm:$0xf]  ;;  %v2141_v11 = vld [vmem:[#allocation8 + $0x208] sm:$0xf0]  ;;  %v2156_v52 = vld [vmem:[#allocation8 + $0x280] sm:$0xf0] }
 0x155   :  { %v298_v13 = vmul.f32 %v2220_v50, %v297_v7  ;;  %v1946_v37 = vld [vmem:[#allocation8 + $0x2c0] sm:$0xf]  ;;  %v2081_v60 = vld [vmem:[#allocation8 + $0x28] sm:$0xf0] }
 0x156   :  { %v353_v43 = vmax.f32 %v345_v29, 0.0  ;;  %v354_v44 = vmax.f32 %v346_v31, 0.0  ;;  %v355_v45 = vmax.f32 %v347_v32, 0.0  ;;  %v356_v46 = vmax.f32 %v348_v33, 0.0  ;;  %v1838_v29 = vld [vmem:[#allocation8 + $0x1e8] sm:$0xf] }
 0x157   :  { %v302_v22 = vsel %vm301_vm6, %v2220_v50, %v298_v13  ;;  %v2117_v13 = vld [vmem:[#allocation8 + $0x148] sm:$0xf0]  ;;  %v2138_v31 = vld [vmem:[#allocation8 + $0x1f0] sm:$0xf0]  ;;  %v1934_v32 = vld [vmem:[#allocation8 + $0x2a8] sm:$0xf] }
 0x158   :  { %v315_v23 = vmul.f32 %v307_v17, %v302_v22  ;;  %v316_v24 = vmul.f32 %v308_v19, %v302_v22  ;;  %v317_v25 = vmul.f32 %v309_v20, %v302_v22  ;;  %v318_v28 = vmul.f32 %v310_v16, %v302_v22  ;;  %v2165_v16 = vld [vmem:[#allocation8 + $0x2c8] sm:$0xf0]  ;;  %v1646_v20 = vld [vmem:[#allocation8 + $0x68] sm:$0xf]  ;;  %v2090_v22 = vld [vmem:[#allocation8 + $0x70] sm:$0xf0] }
 0x159   :  { %v2162_v33 = vld [vmem:[#allocation8 + $0x2b0] sm:$0xf0]  ;;  %v1839_v18 = vor.u32 %v2138_v31, %v1838_v29  ;;  %v1610_v59 = vld [vmem:[#allocation8 + $0x20] sm:$0xf] }
 0x15a   :  { %v332_v36 = vmul.f32 %v320_v58, %v315_v23  ;;  %v333_v34 = vmul.f32 %v321_v1, %v316_v24  ;;  %v334_v35 = vmul.f32 %v322_v2, %v317_v25  ;;  %v335_v27 = vmul.f32 %v323_v3, %v318_v28  ;;  %v1766_v1 = vld [vmem:[#allocation8 + $0x158] sm:$0xf]  ;;  %v2120_v2 = vld [vmem:[#allocation8 + $0x160] sm:$0xf0]  ;;  %v1742_v25 = vld [vmem:[#allocation8 + $0x128] sm:$0xf] }
 0x15b   :  { %v1862_v3 = vld [vmem:[#allocation8 + $0x218] sm:$0xf]  ;;  %v1767_v7 = vor.u32 %v2120_v2, %v1766_v1  ;;  %v1851_v23 = vor.u32 %v2141_v11, %v1850_v14  ;;  %v1947_v24 = vor.u32 %v2165_v16, %v1946_v37  ;;  %v2114_v28 = vld [vmem:[#allocation8 + $0x130] sm:$0xf0]  ;;  %v1935_v30 = vor.u32 %v2162_v33, %v1934_v32  ;;  %v1706_v1 = vld [vmem:[#allocation8 + $0xe0] sm:$0xf] }
 0x15c   :  { %v349_v15 = vadd.f32 %v337_v62, %v332_v36  ;;  %v350_v39 = vadd.f32 %v338_v8, %v333_v34  ;;  %v351_v40 = vadd.f32 %v339_v12, %v334_v35  ;;  %v352_v26 = vadd.f32 %v340_v63, %v335_v27  ;;  %v1658_v62 = vld [vmem:[#allocation8 + $0x80] sm:$0xf]  ;;  %v2093_v8 = vld [vmem:[#allocation8 + $0x88] sm:$0xf0]  ;;  %v1634_v35 = vld [vmem:[#allocation8 + $0x50] sm:$0xf] }
 0x15d   :  { %v1863_v9 = vor.u32 %v2144_v4, %v1862_v3  ;;  %v1959_v12 = vor.u32 %v2168_v21, %v1958_v5  ;;  %v1754_v63 = vld [vmem:[#allocation8 + $0x140] sm:$0xf]  ;;  %v1659_v17 = vor.u32 %v2093_v8, %v1658_v62  ;;  %v1647_v36 = vor.u32 %v2090_v22, %v1646_v20  ;;  %v2087_v27 = vld [vmem:[#allocation8 + $0x58] sm:$0xf0]  ;;  %v2105_v2 = vld [vmem:[#allocation8 + $0xe8] sm:$0xf0] }
 0x15e   :  { %v357_v48 = vmax.f32 %v349_v15, 0.0  ;;  %v358_v49 = vmax.f32 %v350_v39, 0.0  ;;  %v359_v50 = vmax.f32 %v351_v40, 0.0  ;;  %v360_v51 = vmax.f32 %v352_v26, 0.0  ;;  %v2111_v15 = vld [vmem:[#allocation8 + $0x118] sm:$0xf0] }
 0x15f   :  { %v1755_v19 = vor.u32 %v2117_v13, %v1754_v63  ;;  %v1743_v34 = vor.u32 %v2114_v28, %v1742_v25  ;;  %v1826_v39 = vld [vmem:[#allocation8 + $0x1d0] sm:$0xf]  ;;  %v2135_v40 = vld [vmem:[#allocation8 + $0x1d8] sm:$0xf0]  ;;  %v1635_v41 = vor.u32 %v2087_v27, %v1634_v35  ;;  %v1731_v42 = vor.u32 %v2111_v15, %v1730_v38  ;;  %v1802_v3 = vld [vmem:[#allocation8 + $0x1a0] sm:$0xf] }
 0x160   :  { %v2561_v55 = vpack.c.bf16 %v357_v48, %v353_v43  ;;  %v2563_v56 = vpack.c.bf16 %v358_v49, %v354_v44  ;;  %v2565_v57 = vpack.c.bf16 %v359_v50, %v355_v45  ;;  %v2567_v58 = vpack.c.bf16 %v360_v51, %v356_v46  ;;  %v1922_v26 = vld [vmem:[#allocation8 + $0x290] sm:$0xf]  ;;  %v1622_v43 = vld [vmem:[#allocation8 + $0x38] sm:$0xf]  ;;  %v2084_v44 = vld [vmem:[#allocation8 + $0x40] sm:$0xf0] }
 0x161   :  { %v1827_v45 = vor.u32 %v2135_v40, %v1826_v39  ;;  %v1923_v46 = vor.u32 %v2159_v10, %v1922_v26  ;;  %v2108_v48 = vld [vmem:[#allocation8 + $0x100] sm:$0xf0]  ;;  %v1814_v49 = vld [vmem:[#allocation8 + $0x1b8] sm:$0xf]  ;;  %v2129_v4 = vld [vmem:[#allocation8 + $0x1a8] sm:$0xf0] }
 0x162   :  { %1021 = vmatmul.bf16.vlgmr.msra.gmra.mxu0 %v2561_v55  ;;  %1035 = vmatmul.bf16.vlgmr.msrb.gmra.mxu1 %v2563_v56  ;;  %v2132_v50 = vld [vmem:[#allocation8 + $0x1c0] sm:$0xf0]  ;;  %v1910_v51 = vld [vmem:[#allocation8 + $0x278] sm:$0xf]  ;;  %v1898_v5 = vld [vmem:[#allocation8 + $0x260] sm:$0xf] }
 0x163   :  { %1049 = vmatmul.bf16.vlgmr.msrb.gmra.mxu2 %v2565_v57  ;;  %1063 = vmatmul.bf16.vlgmr.msra.gmra.mxu3 %v2567_v58  ;;  %v2153_v21 = vld [vmem:[#allocation8 + $0x268] sm:$0xf0]  ;;  %v1598_v62 = vld [vmem:[#allocation8 + $0x8] sm:$0xf]  ;;  %v2078_v8 = vld [vmem:[#allocation8 + $0x10] sm:$0xf0] }
 0x164   :  { %1125 = vmatpush.bf16.msra.mxu0 %v1683_v53  ;;  %1139 = vmatpush.bf16.msrb.mxu1 %v1779_v54  ;;  %v1623_v53 = vor.u32 %v2084_v44, %v1622_v43  ;;  %v1719_v54 = vor.u32 %v2108_v48, %v1718_v47  ;;  %v1694_v63 = vld [vmem:[#allocation8 + $0xc8] sm:$0xf]  ;;  %v2102_v13 = vld [vmem:[#allocation8 + $0xd0] sm:$0xf0] }
 0x165   :  { %1153 = vmatpush.bf16.msrb.mxu2 %v1875_v61  ;;  %1167 = vmatpush.bf16.msra.mxu3 %v1971_v0  ;;  %v1815_v61 = vor.u32 %v2132_v50, %v1814_v49  ;;  %v1911_v0 = vor.u32 %v2156_v52, %v1910_v51  ;;  %v1790_v14 = vld [vmem:[#allocation8 + $0x188] sm:$0xf]  ;;  %v2126_v11 = vld [vmem:[#allocation8 + $0x190] sm:$0xf0] }
 0x166   :  { %v1886_v37 = vld [vmem:[#allocation8 + $0x248] sm:$0xf]  ;;  %v2150_v16 = vld [vmem:[#allocation8 + $0x250] sm:$0xf0]  ;;  %v1791_v20 = vor.u32 %v2126_v11, %v1790_v14 }
 0x167   :  { %v1887_v22 = vor.u32 %v2150_v16, %v1886_v37  ;;  %v493_v35 = vld [vmem:[#allocation10] ss:$4 sm:$0x7] }
 0x168   :  { %1126 = vmatpush.bf16.msra.mxu0 %v1671_v6  ;;  %1140 = vmatpush.bf16.msrb.mxu1 %v1767_v7  ;;  %v1611_v6 = vor.u32 %v2081_v60, %v1610_v59  ;;  %v1707_v7 = vor.u32 %v2105_v2, %v1706_v1  ;;  %v496_v27 = vperm.slane %v493_v35, 1  ;;  %v497_v26 = vperm.slane %v493_v35, 2 }
 0x169   :  { %1154 = vmatpush.bf16.msrb.mxu2 %v1863_v9  ;;  %1168 = vmatpush.bf16.msra.mxu3 %v1959_v12  ;;  %v1803_v9 = vor.u32 %v2129_v4, %v1802_v3  ;;  %v1899_v12 = vor.u32 %v2153_v21, %v1898_v5 }
 0x16c   :  { %1127 = vmatpush.bf16.msra.mxu0 %v1659_v17  ;;  %1141 = vmatpush.bf16.msrb.mxu1 %v1755_v19  ;;  %v1599_v17 = vor.u32 %v2078_v8, %v1598_v62  ;;  %v1695_v19 = vor.u32 %v2102_v13, %v1694_v63 }
 0x16d   :  { %1155 = vmatpush.bf16.msrb.mxu2 %v1851_v23  ;;  %1169 = vmatpush.bf16.msra.mxu3 %v1947_v24 }
 0x170   :  { %1128 = vmatpush.bf16.msra.mxu0 %v1647_v36  ;;  %1142 = vmatpush.bf16.msrb.mxu1 %v1743_v34 }
 0x171   :  { %1156 = vmatpush.bf16.msrb.mxu2 %v1839_v18  ;;  %1170 = vmatpush.bf16.msra.mxu3 %v1935_v30  ;;  %v495_v30 = vperm.slane %v493_v35, 0  ;;  %v2193_v35 = vld [vmem:[#allocation11 + $0xa8] sm:$0xff] }
 0x172   :  { %1077 = vmatmul.bf16.vlgmr.msrb.gmra.mxu0 %v2561_v55  ;;  %1091 = vmatmul.bf16.vlgmr.msra.gmra.mxu1 %v2563_v56 }
 0x173   :  { %1105 = vmatmul.bf16.vlgmr.msra.gmra.mxu2 %v2565_v57  ;;  %1119 = vmatmul.bf16.vlgmr.msrb.gmra.mxu3 %v2567_v58 }
 0x174   :  { %1129 = vmatpush.bf16.msra.mxu0 %v1635_v41  ;;  %1143 = vmatpush.bf16.msrb.mxu1 %v1731_v42 }
 0x175   :  { %1157 = vmatpush.bf16.msrb.mxu2 %v1827_v45  ;;  %1171 = vmatpush.bf16.msra.mxu3 %v1923_v46 }
 0x178   :  { %1130 = vmatpush.bf16.msra.mxu0 %v1623_v53  ;;  %1144 = vmatpush.bf16.msrb.mxu1 %v1719_v54 }
 0x179   :  { %1158 = vmatpush.bf16.msrb.mxu2 %v1815_v61  ;;  %1172 = vmatpush.bf16.msra.mxu3 %v1911_v0 }
 0x17c   :  { %1131 = vmatpush.bf16.msra.mxu0 %v1611_v6  ;;  %1145 = vmatpush.bf16.msrb.mxu1 %v1707_v7 }
 0x17d   :  { %1159 = vmatpush.bf16.msrb.mxu2 %v1803_v9  ;;  %1173 = vmatpush.bf16.msra.mxu3 %v1899_v12 }
 0x180   :  { %1132 = vmatpush.bf16.msra.mxu0 %v1599_v17  ;;  %1146 = vmatpush.bf16.msrb.mxu1 %v1695_v19 }
 0x181   :  { %1160 = vmatpush.bf16.msrb.mxu2 %v1791_v20  ;;  %1174 = vmatpush.bf16.msra.mxu3 %v1887_v22 }
 0x183   :  { %1133 = vmatmul.bf16.vlgmr.msra.gmra.mxu0 %v2561_v55  ;;  %1147 = vmatmul.bf16.vlgmr.msrb.gmra.mxu1 %v2563_v56 }
 0x184   :  { %1161 = vmatmul.bf16.vlgmr.msrb.gmra.mxu2 %v2565_v57  ;;  %1175 = vmatmul.bf16.vlgmr.msra.gmra.mxu3 %v2567_v58 }
 0x1df   :  { %v1022_v23 = vpop.f32.mrf.mxu0  ;;  %v1036_v24 = vpop.f32.mrf.mxu1 }
 0x1e0   :  { %v1023_v15 = vadd.f32 %v1022_v23, %v495_v30 }
 0x1e2   :  { %v1037_v10 = vadd.f32 %v1036_v24, %v1023_v15 }
 0x1e6   :  { %v1050_v25 = vpop.f32.mrf.mxu2  ;;  %v1064_v28 = vpop.f32.mrf.mxu3 }
 0x1e7   :  { %v1024_v29 = vpop.f32.mrf.mxu0  ;;  %v1038_v31 = vpop.f32.mrf.mxu1  ;;  %v1051_v43 = vadd.f32 %v1050_v25, %v1037_v10  ;;  %v2179_v25 = vld [vmem:[#allocation11 + $0x38] sm:$0xff]  ;;  %v2190_v10 = vld [vmem:[#allocation11 + $0x90] sm:$0xff] }
 0x1e8   :  { %v1025_v47 = vadd.f32 %v1024_v29, %v495_v30  ;;  %v2195_v29 = vld [vmem:[#allocation11 + $0xb8] sm:$0xff]  ;;  %1482 = vmatpush.bf16.msrb.mxu0 %v2179_v25 }
 0x1e9   :  { %v2583_v49 = vadd.f32 %v1064_v28, %v1051_v43  ;;  %v2187_v28 = vld [vmem:[#allocation11 + $0x78] sm:$0xff]  ;;  %1510 = vmatpush.bf16.msra.mxu2 %v2195_v29  ;;  %v2173_v43 = vld [vmem:[#allocation11 + $0x8] sm:$0xff] }
 0x1ea   :  { %v1039_v54 = vadd.f32 %v1038_v31, %v1025_v47  ;;  %1496 = vmatpush.bf16.msra.mxu1 %v2187_v28  ;;  %v2178_v31 = vld [vmem:[#allocation11 + $0x30] sm:$0xff]  ;;  %v2175_v30 = vld [vmem:[#allocation11 + $0x18] sm:$0xff] }
 0x1eb   :  { %v1193_v1 = vmul.f32 %v2583_v49, %v2583_v49  ;;  %v1184_v25 = vld [vmem:[#allocation10 + $0x2] ss:$4 sm:$0x7] }
 0x1ec   :  { %1483 = vmatpush.bf16.msrb.mxu0 %v2178_v31 }
 0x1ee   :  { %v1052_v32 = vpop.f32.mrf.mxu2  ;;  %v1066_v33 = vpop.f32.mrf.mxu3 }
 0x1ef   :  { %v1078_v36 = vpop.f32.mrf.mxu0  ;;  %v1092_v34 = vpop.f32.mrf.mxu1  ;;  %v1053_v2 = vadd.f32 %v1052_v32, %v1039_v54  ;;  %v2186_v32 = vld [vmem:[#allocation11 + $0x70] sm:$0xff] }
 0x1f0   :  { %v1079_v57 = vadd.f32 %v1078_v36, %v496_v27  ;;  %1497 = vmatpush.bf16.msra.mxu1 %v2186_v32  ;;  %v2177_v36 = vld [vmem:[#allocation11 + $0x28] sm:$0xff] }
 0x1f1   :  { %v2598_v9 = vadd.f32 %v1066_v33, %v1053_v2  ;;  %v2194_v33 = vld [vmem:[#allocation11 + $0xb0] sm:$0xff]  ;;  %1484 = vmatpush.bf16.msrb.mxu0 %v2177_v36  ;;  %v1266_v36 = vperm.slane %v1184_v25, 1 }
 0x1f2   :  { %v1093_v58 = vadd.f32 %v1092_v34, %v1079_v57  ;;  %1511 = vmatpush.bf16.msra.mxu2 %v2194_v33  ;;  %v2185_v34 = vld [vmem:[#allocation11 + $0x68] sm:$0xff]  ;;  %v1265_v33 = vperm.slane %v1184_v25, 0 }
 0x1f3   :  { %v1196_v16 = vmul.f32 %v2598_v9, %v2598_v9 }
 0x1f4   :  { %1498 = vmatpush.bf16.msra.mxu1 %v2185_v34  ;;  %v1267_v34 = vperm.slane %v1184_v25, 2 }
 0x1f6   :  { %v1106_v18 = vpop.f32.mrf.mxu2  ;;  %v1120_v55 = vpop.f32.mrf.mxu3  ;;  %1512 = vmatpush.bf16.msra.mxu2 %v2193_v35 }
 0x1f7   :  { %v1080_v56 = vpop.f32.mrf.mxu0  ;;  %v1094_v38 = vpop.f32.mrf.mxu1  ;;  %v1107_v41 = vadd.f32 %v1106_v18, %v1093_v58  ;;  %v2184_v18 = vld [vmem:[#allocation11 + $0x60] sm:$0xff] }
 0x1f8   :  { %v1081_v44 = vadd.f32 %v1080_v56, %v496_v27  ;;  %v2176_v27 = vld [vmem:[#allocation11 + $0x20] sm:$0xff]  ;;  %1499 = vmatpush.bf16.msra.mxu1 %v2184_v18  ;;  %v2183_v56 = vld [vmem:[#allocation11 + $0x58] sm:$0xff] }
 0x1f9   :  { %v2581_v48 = vadd.f32 %v1120_v55, %v1107_v41  ;;  %v2192_v55 = vld [vmem:[#allocation11 + $0xa0] sm:$0xff]  ;;  %1485 = vmatpush.bf16.msrb.mxu0 %v2176_v27 }
 0x1fa   :  { %v1095_v50 = vadd.f32 %v1094_v38, %v1081_v44  ;;  %1513 = vmatpush.bf16.msra.mxu2 %v2192_v55  ;;  %v2191_v38 = vld [vmem:[#allocation11 + $0x98] sm:$0xff]  ;;  %v2181_v44 = vld [vmem:[#allocation11 + $0x48] sm:$0xff] }
 0x1fb   :  { %v1194_v59 = vmul.f32 %v2581_v48, %v2581_v48  ;;  %v1185_v5 = vadd.f32 %v2581_v48, %v2583_v49 }
 0x1fc   :  { %1500 = vmatpush.bf16.msra.mxu1 %v2183_v56 }
 0x1fd   :  { %v1199_v62 = vadd.f32 %v1194_v59, %v1193_v1  ;;  %1486 = vmatpush.bf16.msrb.mxu0 %v2175_v30  ;;  %v2188_v59 = vld [vmem:[#allocation11 + $0x80] sm:$0xff] }
 0x1fe   :  { %v1108_v39 = vpop.f32.mrf.mxu2  ;;  %v1122_v40 = vpop.f32.mrf.mxu3  ;;  %1514 = vmatpush.bf16.msra.mxu2 %v2191_v38 }
 0x1ff   :  { %v1109_v60 = vadd.f32 %v1108_v39, %v1095_v50 }
 0x200   :  { %v1134_v42 = vpop.f32.mrf.mxu0  ;;  %v1148_v46 = vpop.f32.mrf.mxu1 }
 0x201   :  { %v1135_v45 = vadd.f32 %v1134_v42, %v497_v26  ;;  %v2593_v21 = vadd.f32 %v1122_v40, %v1109_v60  ;;  %v2174_v40 = vld [vmem:[#allocation11 + $0x10] sm:$0xff] }
 0x202   :  { %1487 = vmatpush.bf16.msrb.mxu0 %v2174_v40  ;;  %1515 = vmatpush.bf16.msra.mxu2 %v2190_v10 }
 0x203   :  { %v1149_v51 = vadd.f32 %v1148_v46, %v1135_v45  ;;  %v1197_v14 = vmul.f32 %v2593_v21, %v2593_v21  ;;  %v1189_v19 = vadd.f32 %v2593_v21, %v2598_v9  ;;  %v2189_v45 = vld [vmem:[#allocation11 + $0x88] sm:$0xff] }
 0x205   :  { %v1203_v23 = vadd.f32 %v1197_v14, %v1196_v16 }
 0x206   :  { %1488 = vmatpush.bf16.msrb.mxu0 %v2173_v43  ;;  %1516 = vmatpush.bf16.msra.mxu2 %v2189_v45 }
 0x207   :  { %v1162_v52 = vpop.f32.mrf.mxu2  ;;  %v1176_v53 = vpop.f32.mrf.mxu3 }
 0x208   :  { %v1163_v61 = vadd.f32 %v1162_v52, %v1149_v51  ;;  %v1136_v0 = vpop.f32.mrf.mxu0  ;;  %v1150_v8 = vpop.f32.mrf.mxu1  ;;  %v2172_v51 = vld [vmem:[#allocation11] sm:$0xff] }
 0x209   :  { %v1137_v4 = vadd.f32 %v1136_v0, %v497_v26  ;;  %v2182_v26 = vld [vmem:[#allocation11 + $0x50] sm:$0xff]  ;;  %v2180_v52 = vld [vmem:[#allocation11 + $0x40] sm:$0xff] }
 0x20a   :  { %v2589_v3 = vadd.f32 %v1176_v53, %v1163_v61  ;;  %1501 = vmatpush.bf16.msra.mxu1 %v2182_v26  ;;  %1489 = vmatpush.bf16.msrb.mxu0 %v2172_v51 }
 0x20b   :  { %v1151_v12 = vadd.f32 %v1150_v8, %v1137_v4  ;;  %1517 = vmatpush.bf16.msra.mxu2 %v2188_v59 }
 0x20c   :  { %v1186_v6 = vadd.f32 %v1185_v5, %v2589_v3  ;;  %v1195_v7 = vmul.f32 %v2589_v3, %v2589_v3 }
 0x20e   :  { %1187 = vadd.xlane.f32.xlu2 %v1186_v6  ;;  %v1200_v63 = vadd.f32 %v1199_v62, %v1195_v7  ;;  %1502 = vmatpush.bf16.msra.mxu1 %v2181_v44 }
 0x20f   :  { %v1164_v13 = vpop.f32.mrf.mxu2  ;;  %v1178_v37 = vpop.f32.mrf.mxu3 }
 0x210   :  { %v1165_v11 = vadd.f32 %v1164_v13, %v1151_v12  ;;  %1201 = vadd.xlane.f32.xlu0 %v1200_v63  ;;  %v1182_v13 = vld [vmem:[#allocation10 + $0x1] ss:$4 sm:$0x7] }
 0x211   :  { %v1253_v28 = vperm.slane %v1182_v13, 1  ;;  %v1254_v31 = vperm.slane %v1182_v13, 2 }
 0x212   :  { %v2604_v17 = vadd.f32 %v1178_v37, %v1165_v11  ;;  %1503 = vmatpush.bf16.msra.mxu1 %v2180_v52 }
 0x214   :  { %v1190_v20 = vadd.f32 %v1189_v19, %v2604_v17  ;;  %v1198_v22 = vmul.f32 %v2604_v17, %v2604_v17 }
 0x216   :  { %1191 = vadd.xlane.f32.xlu2 %v1190_v20  ;;  %v1204_v24 = vadd.f32 %v1203_v23, %v1198_v22  ;;  %v1252_v20 = vperm.slane %v1182_v13, 0 }
 0x218   :  { %1205 = vadd.xlane.f32.xlu1 %v1204_v24 }
 0x281   :  { %v1188_v57 = vpop.xlane.xlu2 %1187 }
 0x282   :  { %v1207_v15 = vmul.f32 0.0033333334, %v1188_v57 }
 0x283   :  { %v1202_v58 = vpop.xlane.xlu0 %1201 }
 0x284   :  { %v1209_v39 = vmul.f32 0.0033333334, %v1202_v58  ;;  %v1211_v41 = vmul.f32 %v1207_v15, %v1207_v15  ;;  %v1239_v14 = vsub.f32 %v2583_v49, %v1207_v15  ;;  %v1240_v11 = vsub.f32 %v2581_v48, %v1207_v15 }
 0x285   :  { %v1241_v19 = vsub.f32 %v2589_v3, %v1207_v15 }
 0x286   :  { %v1213_v42 = vsub.f32 %v1209_v39, %v1211_v41 }
 0x288   :  { %v1215_v46 = vmax.f32 %v1213_v42, 0.0 }
 0x289   :  { %v1192_v47 = vpop.xlane.xlu2 %1191 }
 0x28a   :  { %v1208_v50 = vmul.f32 0.0033333334, %v1192_v47  ;;  %v1217_v53 = vadd.f32 1e-05, %v1215_v46 }
 0x28b   :  { %v1206_v54 = vpop.xlane.xlu1 %1205 }
 0x28c   :  { %v1210_v60 = vmul.f32 0.0033333334, %v1206_v54  ;;  %2221 = vrsqrt.f32 %v1217_v53  ;;  %v1212_v61 = vmul.f32 %v1208_v50, %v1208_v50  ;;  %vm1225_vm8 = vweird.f32 %v1217_v53 }
 0x28d   :  { %v1242_v27 = vsub.f32 %v2598_v9, %v1208_v50  ;;  %v1243_v3 = vsub.f32 %v2593_v21, %v1208_v50  ;;  %v1244_v18 = vsub.f32 %v2604_v17, %v1208_v50 }
 0x28e   :  { %v1214_v0 = vsub.f32 %v1210_v60, %v1212_v61 }
 0x290   :  { %v1216_v1 = vmax.f32 %v1214_v0, 0.0 }
 0x292   :  { %v2222_v2 = vpop.eup %2221  ;;  %v1218_v4 = vadd.f32 1e-05, %v1216_v1 }
 0x293   :  { %v1220_v5 = vmul.f32 %v2222_v2, %v1217_v53  ;;  %vm1226_vm7 = vweird.f32 %v2222_v2  ;;  %v2216_v53 = vld [vmem:[%s2632_s6] ss:$0 sm:$0xff] }
 0x294   :  { %2223 = vrsqrt.f32 %v1218_v4  ;;  %vm1227_vm9 = vmor %vm1225_vm8, %vm1226_vm7  ;;  %vm1235_vm11 = vweird.f32 %v1218_v4 }
 0x295   :  { %v1221_v6 = vmul.f32 %v2222_v2, %v1220_v5 }
 0x297   :  { %v1222_v7 = vmul.f32 0.5, %v1221_v6 }
 0x299   :  { %v1223_v62 = vsub.f32 1.5, %v1222_v7 }
 0x29a   :  { %v2224_v8 = vpop.eup %2223 }
 0x29b   :  { %v1224_v12 = vmul.f32 %v2222_v2, %v1223_v62  ;;  %v1230_v63 = vmul.f32 %v2224_v8, %v1218_v4  ;;  %vm1236_vm10 = vweird.f32 %v2224_v8 }
 0x29c   :  { %vm1237_vm12 = vmor %vm1235_vm11, %vm1236_vm10 }
 0x29d   :  { %v1228_v37 = vsel %vm1227_vm9, %v2222_v2, %v1224_v12  ;;  %v1231_v16 = vmul.f32 %v2224_v8, %v1230_v63 }
 0x29e   :  { %v1245_v22 = vmul.f32 %v1239_v14, %v1228_v37  ;;  %v1246_v23 = vmul.f32 %v1240_v11, %v1228_v37  ;;  %v1247_v29 = vmul.f32 %v1241_v19, %v1228_v37 }
 0x29f   :  { %v1232_v24 = vmul.f32 0.5, %v1231_v16 }
 0x2a0   :  { %v1258_v48 = vmul.f32 %v1252_v20, %v1245_v22  ;;  %v1259_v35 = vmul.f32 %v1253_v28, %v1246_v23  ;;  %v1260_v55 = vmul.f32 %v1254_v31, %v1247_v29 }
 0x2a1   :  { %v1233_v32 = vsub.f32 1.5, %v1232_v24 }
 0x2a2   :  { %v1271_v15 = vadd.f32 %v1265_v33, %v1258_v48  ;;  %v1272_v58 = vadd.f32 %v1266_v36, %v1259_v35  ;;  %v1273_v10 = vadd.f32 %v1267_v34, %v1260_v55 }
 0x2a3   :  { %v1234_v49 = vmul.f32 %v2224_v8, %v1233_v32 }
 0x2a4   :  { %v1277_v9 = vmax.f32 %v1271_v15, 0.0  ;;  %v1278_v44 = vmax.f32 %v1272_v58, 0.0  ;;  %v1279_v17 = vmax.f32 %v1273_v10, 0.0 }
 0x2a5   :  { %v1238_v30 = vsel %vm1237_vm12, %v2224_v8, %v1234_v49 }
 0x2a6   :  { %v1248_v56 = vmul.f32 %v1242_v27, %v1238_v30  ;;  %v1249_v38 = vmul.f32 %v1243_v3, %v1238_v30  ;;  %v1250_v57 = vmul.f32 %v1244_v18, %v1238_v30 }
 0x2a8   :  { %v1261_v39 = vmul.f32 %v1252_v20, %v1248_v56  ;;  %v1262_v40 = vmul.f32 %v1253_v28, %v1249_v38  ;;  %v1263_v26 = vmul.f32 %v1254_v31, %v1250_v57 }
 0x2aa   :  { %v1274_v41 = vadd.f32 %v1265_v33, %v1261_v39  ;;  %v1275_v42 = vadd.f32 %v1266_v36, %v1262_v40  ;;  %v1276_v43 = vadd.f32 %v1267_v34, %v1263_v26 }
 0x2ac   :  { %v1280_v21 = vmax.f32 %v1274_v41, 0.0  ;;  %v1281_v45 = vmax.f32 %v1275_v42, 0.0  ;;  %v1282_v46 = vmax.f32 %v1276_v43, 0.0 }
 0x2ae   :  { %v1283_v47 = vpack.c.bf16 %v1280_v21, %v1277_v9  ;;  %v1284_v50 = vpack.c.bf16 %v1281_v45, %v1278_v44  ;;  %v1285_v51 = vpack.c.bf16 %v1282_v46, %v1279_v17 }
 0x2b0   :  { %1490 = vmatmul.bf16.vlgmr.msrb.gmra.mxu0 %v1283_v47  ;;  %1504 = vmatmul.bf16.vlgmr.msra.gmra.mxu1 %v1284_v50 }
 0x2b1   :  { %1518 = vmatmul.bf16.vlgmr.msra.gmra.mxu2 %v1285_v51 }
 0x32d   :  { %v1491_v52 = vpop.f32.mrf.mxu0  ;;  %v1505_v54 = vpop.f32.mrf.mxu1 }
 0x32e   :  { %v1492_v59 = vadd.f32 %v2216_v53, %v1491_v52 }
 0x330   :  { %v1506_v1 = vadd.f32 %v1505_v54, %v1492_v59 }
 0x334   :  { %v1519_v60 = vpop.f32.mrf.mxu2 }
 0x335   :  { %v1493_v61 = vpop.f32.mrf.mxu0  ;;  %v1520_v2 = vadd.f32 %v1519_v60, %v1506_v1  ;;  %v1507_v4 = vpop.f32.mrf.mxu1 }
 0x336   :  { %v1494_v0 = vadd.f32 %v2216_v53, %v1493_v61 }
 0x337   :  { %2225 = vtanh.f32 %v1520_v2 }
 0x338   :  { %v1508_v5 = vadd.f32 %v1507_v4, %v1494_v0 }
 0x33c   :  { %v1521_v6 = vpop.f32.mrf.mxu2 }
 0x33d   :  { %v1522_v7 = vadd.f32 %v1521_v6, %v1508_v5  ;;  %v2226_v62 = vpop.eup %2225 }
 0x33f   :  { %2227 = vtanh.f32 %v1522_v7 }
 0x345   :  { %v2228_v8 = vpop.eup %2227 }
 0x346   :  { %v2199_v12 = vpack.c.bf16 %v2228_v8, %v2226_v62 }
 0x348   :  { %2200 = vst [vmem:[#allocation13] sm:$0xff] %v2199_v12  }
 0x349   :  { %1542 = dma.vmem_to_hbm [thread:$0]  %s1535_s13, 128, %s1537_s15, [#allocation4], %s2419_s10, %s2419_s10, %s2420_s11  }
 0x34a   :  { %2405 = dma.done.wait [#allocation4], 128  }
 0x34b   :  { %2406 = vsyncadd [#allocation4], 4294967168 }
 0x34c   :  { %1547 = vsyncpa [#allocation3], 1 }
 0x34d   :  { %1548 = vsyncpa [#allocation6], 1 }
 0x34e   :  { %1549 = vsyncpa [#allocation9], 1 }
 0x34f   :  { %1550 = vsyncpa [#allocation12], 1 }
 0x350   :  { %1551 = vsyncpa [#allocation4], 1 }

</bundles_post_ra>
